<compile_context>
chip_gen: v7x
topology: tpu7x:2x2x1
jax: 0.10.0
libtpu: 0.0.40
codegen_flags: <defaults>
</compile_context>

<pallas_src>
import math

import jax
import jax.numpy as jnp
from jax.experimental import pallas as pl
from jax.experimental.pallas import tpu as pltpu

# ----------------------------- hyper-parameters ------------------------------
STATE_VOCAB = 8        # len(STATE_MAPPING)
ACTION_VOCAB = 5       # len(ACTION_MAPPING)
D_MODEL_BASE = 8       # constructor arg `d_model`
STATE_DIM = 2
ACTION_DIM = 2
NUM_TASKS = 3
NHEAD = 4
NUM_LAYERS = 2
DFF = 2048             # nn.TransformerEncoderLayer default dim_feedforward
D = D_MODEL_BASE * (1 + STATE_DIM + ACTION_DIM + 1)   # == self.d_model == 48
DH = D // NHEAD                                       # 12
LN_EPS = 1e-5

B = 2                  # batch
T = 8                  # sequence length
BT = B * T
LANE = 128             # lane-tile width
AP = 128               # lane-padded action-head width (sliced to ACTION_DIM in JAX)
FF_CHUNK = 512         # DFF chunk size for the feed-forward

# rows of the per-layer vector params: shape [NUM_LAYERS, NVEC, D]
IDX_BO, IDX_B2, IDX_LN1G, IDX_LN1B, IDX_LN2G, IDX_LN2B = 0, 1, 2, 3, 4, 5
NVEC = 6


# --------------------------------- kernel ------------------------------------
def _layer_norm(x, g, b):
    mu = jnp.mean(x, axis=-1, keepdims=True)
    xc = x - mu
    var = jnp.mean(xc * xc, axis=-1, keepdims=True)
    return xc * jax.lax.rsqrt(var + LN_EPS) * g + b


def transformer_kernel(seq_ref, hmask_ref, bias_ref, wqkv_ref, wo_ref, w1_ref,
                       w2_ref, bqkv_ref, vecs_ref, b1_ref, hw_ref, hb_ref,
                       out_ref, x_ref):
    l = pl.program_id(0)

    @pl.when(l == 0)
    def _():
        x_ref[...] = seq_ref[...]

    x = x_ref[...]                                   # [BT, D] f32 (carried)
    hmask = hmask_ref[...]                           # [NHEAD*BT, D] head column mask
    bias = bias_ref[...]                             # [NHEAD*BT, BT] batch block bias

    bo = vecs_ref[IDX_BO:IDX_BO + 1, :]
    b2 = vecs_ref[IDX_B2:IDX_B2 + 1, :]
    ln1g = vecs_ref[IDX_LN1G:IDX_LN1G + 1, :]
    ln1b = vecs_ref[IDX_LN1B:IDX_LN1B + 1, :]
    ln2g = vecs_ref[IDX_LN2G:IDX_LN2G + 1, :]
    ln2b = vecs_ref[IDX_LN2B:IDX_LN2B + 1, :]

    # ---- fused QKV projection (Q weights/bias pre-scaled by 1/sqrt(DH)) ----
    # bf16 MXU inputs, f32 accumulation; each projection sits in its own
    # 128-lane tile so the slices below start on lane-tile boundaries.
    qkv = jnp.dot(x.astype(jnp.bfloat16), wqkv_ref[...],
                  preferred_element_type=jnp.float32) + bqkv_ref[...]    # [BT, 3*128]
    q = qkv[:, 0:D]
    k = qkv[:, LANE:LANE + D]
    v = qkv[:, 2 * LANE:2 * LANE + D]

    # ---- batched multi-head attention (rows = head * BT + token) ----
    qs = jnp.concatenate([q] * NHEAD, axis=0) * hmask                    # [H*BT, D]
    s = jax.lax.dot_general(qs.astype(jnp.bfloat16), k.astype(jnp.bfloat16),
                            (((1,), (1,)), ((), ())),
                            preferred_element_type=jnp.float32) + bias   # [H*BT, BT]
    s = s - jnp.max(s, axis=-1, keepdims=True)
    p = jnp.exp(s)
    p = p * pl.reciprocal(jnp.sum(p, axis=-1, keepdims=True), approx=True)
    c = jnp.dot(p.astype(jnp.bfloat16), v.astype(jnp.bfloat16),
                preferred_element_type=jnp.float32) * hmask              # [H*BT, D]
    ctx = c[0:BT, :]
    for h in range(1, NHEAD):                       # concat-of-heads via masked sum
        ctx = ctx + c[h * BT:(h + 1) * BT, :]

    attn = jnp.dot(ctx.astype(jnp.bfloat16), wo_ref[...],
                   preferred_element_type=jnp.float32) + bo

    # post-norm residual 1
    x = _layer_norm(x + attn, ln1g, ln1b)

    # ---- feed-forward (relu), chunked over DFF; bf16 weights, f32 accumulation ----
    xb = x.astype(jnp.bfloat16)
    h2 = jnp.zeros((BT, D), jnp.float32)
    for c0 in range(0, DFF, FF_CHUNK):
        h1 = jnp.dot(xb, w1_ref[:, c0:c0 + FF_CHUNK],
                     preferred_element_type=jnp.float32) + b1_ref[:, c0:c0 + FF_CHUNK]
        h1 = jnp.maximum(h1, 0.0)
        h2 = h2 + jnp.dot(h1.astype(jnp.bfloat16), w2_ref[c0:c0 + FF_CHUNK, :],
                          preferred_element_type=jnp.float32)

    # post-norm residual 2
    x = _layer_norm(x + h2 + b2, ln2g, ln2b)
    x_ref[...] = x

    # ---- action head on the last layer: lane-dense [BT, AP] slab ----
    @pl.when(l == pl.num_programs(0) - 1)
    def _():
        out = jnp.dot(x.astype(jnp.bfloat16), hw_ref[...],
                      preferred_element_type=jnp.float32) + hb_ref[...]
        out_ref[...] = out.astype(out_ref.dtype)


# ------------------------------ kernel wrapper --------------------------------
def run_transformer(seq, params):
    seq2d = seq.reshape(BT, D).astype(jnp.float32)

    # Head column mask and per-batch block-diagonal additive bias, precomputed
    # as tiny VMEM-resident operands (no in-kernel iota / where chains).
    row = jnp.arange(NHEAD * BT, dtype=jnp.int32)
    col_d = jnp.arange(D, dtype=jnp.int32)
    col_t = jnp.arange(BT, dtype=jnp.int32)
    hmask = ((col_d[None, :] // DH) == (row[:, None] // BT)).astype(jnp.float32)
    bias = jnp.where(((row[:, None] % BT) // T) == (col_t[None, :] // T),
                     jnp.float32(0.0), jnp.float32(-1e30))

    grid_spec = pltpu.PrefetchScalarGridSpec(
        num_scalar_prefetch=0,
        grid=(NUM_LAYERS,),
        in_specs=[
            pl.BlockSpec((BT, D), lambda l: (0, 0)),                    # seq (resident)
            pl.BlockSpec((NHEAD * BT, D), lambda l: (0, 0)),            # head mask
            pl.BlockSpec((NHEAD * BT, BT), lambda l: (0, 0)),           # attn bias
            pl.BlockSpec((None, D, 3 * LANE), lambda l: (l, 0, 0)),     # wqkv (bf16)
            pl.BlockSpec((None, D, D), lambda l: (l, 0, 0)),            # wo   (bf16)
            pl.BlockSpec((None, D, DFF), lambda l: (l, 0, 0)),          # w1   (bf16)
            pl.BlockSpec((None, DFF, D), lambda l: (l, 0, 0)),          # w2   (bf16)
            pl.BlockSpec((None, 1, 3 * LANE), lambda l: (l, 0, 0)),     # bqkv
            pl.BlockSpec((None, NVEC, D), lambda l: (l, 0, 0)),         # per-layer vecs
            pl.BlockSpec((None, 1, DFF), lambda l: (l, 0, 0)),          # b1
            pl.BlockSpec((D, AP), lambda l: (0, 0)),                    # hw (bf16)
            pl.BlockSpec((1, AP), lambda l: (0, 0)),                    # hb
        ],
        out_specs=pl.BlockSpec((BT, AP), lambda l: (0, 0)),
        scratch_shapes=[pltpu.VMEM((BT, D), jnp.float32)],              # carried x
    )

    out = pl.pallas_call(
        transformer_kernel,
        out_shape=jax.ShapeDtypeStruct((BT, AP), jnp.float32),
        grid_spec=grid_spec,
        compiler_params=pltpu.CompilerParams(dimension_semantics=("arbitrary",)),
    )(seq2d, hmask, bias, params["wqkv"], params["wo"], params["w1"], params["w2"],
      params["bqkv"], params["vecs"], params["b1"], params["hw"], params["hb"])

    return out.reshape(B, T, AP)[:, :, :ACTION_DIM]       # [B, T, ACTION_DIM]


# ------------------------------- JAX glue -------------------------------------
def build_sequence(params, states, states_info, actions, actions_info, rewards, task_ids):
    dm = D_MODEL_BASE
    bsz, seq_len, s_dim = states.shape
    a_dim = actions.shape[-1]

    # state embedding: cat(class_emb, state_value) per state component
    ce = params["state_emb"][states_info]                               # [B, S, dm-1]
    ce = jnp.broadcast_to(ce[:, None, :, :], (bsz, seq_len, s_dim, dm - 1))
    state_emb = jnp.concatenate([ce, states[..., None]], axis=-1)       # [B, T, S, dm]
    state_emb = state_emb.reshape(bsz, seq_len, s_dim * dm)

    # action embedding
    ca = params["action_emb"][actions_info]                             # [B, A, dm-1]
    ca = jnp.broadcast_to(ca[:, None, :, :], (bsz, seq_len, a_dim, dm - 1))
    action_emb = jnp.concatenate([ca, actions[..., None]], axis=-1)     # [B, T, A, dm]
    action_emb = action_emb.reshape(bsz, seq_len, a_dim * dm)

    # reward embedding: Linear(1, dm)
    reward_emb = rewards @ params["rw_w"] + params["rw_b"]              # [B, T, dm]

    # task embedding, repeated over time
    task_emb = params["task_emb"][task_ids][:, None, :]                 # [B, 1, dm]
    task_emb = jnp.broadcast_to(task_emb, (bsz, seq_len, dm))

    return jnp.concatenate([task_emb, state_emb, action_emb, reward_emb], axis=-1)  # [B, T, D]


def forward(params, states, states_info, actions, actions_info, rewards, task_ids):
    seq = build_sequence(params, states, states_info, actions, actions_info, rewards, task_ids)
    enc_out = run_transformer(seq, params)          # [B, T, ACTION_DIM]
    return enc_out[:, :-1, :]                       # [B, T-1, ACTION_DIM]


# ---------------------------- parameter init ----------------------------------
def init_params(key):
    ks = jax.random.split(key, 12)

    def n(k, shape, scale=0.02):
        return scale * jax.random.normal(k, shape, dtype=jnp.float32)

    attn_scale = 1.0 / math.sqrt(DH)

    # lane-tile-packed QKV weights [L, D, 3*128]: cols [0:D] = Wq * 1/sqrt(DH),
    # [128:128+D] = Wk, [256:256+D] = Wv, rest zero.
    wq = n(ks[4], (NUM_LAYERS, D, D)) * attn_scale
    wk = n(ks[5], (NUM_LAYERS, D, D))
    wv = n(ks[6], (NUM_LAYERS, D, D))
    wqkv = jnp.zeros((NUM_LAYERS, D, 3 * LANE), jnp.float32)
    wqkv = wqkv.at[:, :, 0:D].set(wq)
    wqkv = wqkv.at[:, :, LANE:LANE + D].set(wk)
    wqkv = wqkv.at[:, :, 2 * LANE:2 * LANE + D].set(wv)
    bqkv = jnp.zeros((NUM_LAYERS, 1, 3 * LANE), jnp.float32)   # bq pre-scaled slot, bk, bv

    # per-layer vectors: bo, b2, ln1g, ln1b, ln2g, ln2b
    vecs = jnp.zeros((NUM_LAYERS, NVEC, D), jnp.float32)
    vecs = vecs.at[:, IDX_LN1G, :].set(1.0).at[:, IDX_LN2G, :].set(1.0)

    # lane-padded action head
    hw = jnp.zeros((D, AP), jnp.float32).at[:, :ACTION_DIM].set(n(ks[10], (D, ACTION_DIM)))

    return {
        # sequence-assembly params (plain JAX glue)
        "state_emb": n(ks[0], (STATE_VOCAB, D_MODEL_BASE - 1)),
        "action_emb": n(ks[1], (ACTION_VOCAB, D_MODEL_BASE - 1)),
        "rw_w": n(ks[2], (1, D_MODEL_BASE)),
        "rw_b": jnp.zeros((D_MODEL_BASE,), jnp.float32),
        "task_emb": n(ks[3], (NUM_TASKS, D_MODEL_BASE)),
        # transformer params (kernel operands), x @ W layout; MXU weights in bf16
        "wqkv": wqkv.astype(jnp.bfloat16),
        "wo": n(ks[7], (NUM_LAYERS, D, D)).astype(jnp.bfloat16),
        "w1": n(ks[8], (NUM_LAYERS, D, DFF)).astype(jnp.bfloat16),
        "w2": n(ks[9], (NUM_LAYERS, DFF, D)).astype(jnp.bfloat16),
        "bqkv": bqkv,
        "vecs": vecs,
        "b1": jnp.zeros((NUM_LAYERS, 1, DFF), jnp.float32),
        "hw": hw.astype(jnp.bfloat16),
        "hb": jnp.zeros((1, AP), jnp.float32),
    }


# ---------------------------------- main ---------------------------------------
if __name__ == "__main__":
    key = jax.random.PRNGKey(0)
    kp, k1, k2, k3, k4, k5, k6 = jax.random.split(key, 7)
    params = init_params(kp)

    states = jax.random.normal(k1, (B, T, STATE_DIM), jnp.float32)
    states_info = jax.random.randint(k2, (B, STATE_DIM), 0, STATE_VOCAB)
    actions = jax.random.normal(k3, (B, T, ACTION_DIM), jnp.float32)
    actions_info = jax.random.randint(k4, (B, ACTION_DIM), 0, ACTION_VOCAB)
    rewards = jax.random.normal(k5, (B, T, 1), jnp.float32)
    task_ids = jax.random.randint(k6, (B,), 0, NUM_TASKS)

    out = forward(params, states, states_info, actions, actions_info, rewards, task_ids)
    out = jax.block_until_ready(out)
    assert out.shape == (B, T - 1, ACTION_DIM), out.shape
    assert out.dtype == jnp.float32
    assert bool(jnp.all(jnp.isfinite(out)))
    print("KERNEL_OK")
</pallas_src>

<mosaic_0001>
module attributes {stable_mosaic.version = 11 : i64} {
  func.func @transformer_kernel(%arg0: i32, %arg1: memref<16x48xf32, #tpu.memory_space<vmem>>, %arg2: memref<64x48xf32, #tpu.memory_space<vmem>>, %arg3: memref<64x16xf32, #tpu.memory_space<vmem>>, %arg4: memref<1x48x384xbf16, #tpu.memory_space<vmem>>, %arg5: memref<1x48x48xbf16, #tpu.memory_space<vmem>>, %arg6: memref<1x48x2048xbf16, #tpu.memory_space<vmem>>, %arg7: memref<1x2048x48xbf16, #tpu.memory_space<vmem>>, %arg8: memref<1x1x384xf32, #tpu.memory_space<vmem>>, %arg9: memref<1x6x48xf32, #tpu.memory_space<vmem>>, %arg10: memref<1x1x2048xf32, #tpu.memory_space<vmem>>, %arg11: memref<48x128xbf16, #tpu.memory_space<vmem>>, %arg12: memref<1x128xf32, #tpu.memory_space<vmem>>, %arg13: memref<16x128xf32, #tpu.memory_space<vmem>>, %arg14: memref<16x48xf32, #tpu.memory_space<vmem>>) attributes {dimension_semantics = [#tpu.dimension_semantics<arbitrary>], iteration_bounds = array<i64: 2>, scalar_prefetch = 0 : i64, scratch_operands = 1 : i64, tpu.core_type = #tpu.core_type<tc>, window_params = [{pipeline_mode = #tpu.pipeline_mode<synchronous>, transform_indices = @transform_0, window_bounds = array<i64: 16, 48>}, {pipeline_mode = #tpu.pipeline_mode<synchronous>, transform_indices = @transform_1, window_bounds = array<i64: 64, 48>}, {pipeline_mode = #tpu.pipeline_mode<synchronous>, transform_indices = @transform_2, window_bounds = array<i64: 64, 16>}, {transform_indices = @transform_3, window_bounds = array<i64: 1, 48, 384>}, {transform_indices = @transform_4, window_bounds = array<i64: 1, 48, 48>}, {transform_indices = @transform_5, window_bounds = array<i64: 1, 48, 2048>}, {transform_indices = @transform_6, window_bounds = array<i64: 1, 2048, 48>}, {transform_indices = @transform_7, window_bounds = array<i64: 1, 1, 384>}, {transform_indices = @transform_8, window_bounds = array<i64: 1, 6, 48>}, {transform_indices = @transform_9, window_bounds = array<i64: 1, 1, 2048>}, {pipeline_mode = #tpu.pipeline_mode<synchronous>, transform_indices = @transform_10, window_bounds = array<i64: 48, 128>}, {pipeline_mode = #tpu.pipeline_mode<synchronous>, transform_indices = @transform_11, window_bounds = array<i64: 1, 128>}, {pipeline_mode = #tpu.pipeline_mode<synchronous>, transform_indices = @transform_12, window_bounds = array<i64: 16, 128>}]} {
    %c0_i32 = arith.constant 0 : i32
    %0 = arith.cmpi eq, %arg0, %c0_i32 : i32
    %1 = arith.extui %0 : i1 to i32
    %c0_i32_0 = arith.constant 0 : i32
    %2 = arith.cmpi ne, %1, %c0_i32_0 : i32
    scf.if %2 {
      %c0_92 = arith.constant 0 : index
      %c0_93 = arith.constant 0 : index
      %168 = vector.load %arg1[%c0_92, %c0_93] : memref<16x48xf32, #tpu.memory_space<vmem>>, vector<16x48xf32>
      %c0_94 = arith.constant 0 : index
      %c0_95 = arith.constant 0 : index
      %169 = vector.load %arg14[%c0_94, %c0_95] : memref<16x48xf32, #tpu.memory_space<vmem>>, vector<16x48xf32>
      tpu.vector_store %arg14[%c0_94, %c0_95], %168 {strides = array<i32>} : memref<16x48xf32, #tpu.memory_space<vmem>>, vector<16x48xf32>,
    } else {
    }
    %c0 = arith.constant 0 : index
    %c0_1 = arith.constant 0 : index
    %3 = vector.load %arg14[%c0, %c0_1] : memref<16x48xf32, #tpu.memory_space<vmem>>, vector<16x48xf32>
    %c0_2 = arith.constant 0 : index
    %c0_3 = arith.constant 0 : index
    %4 = vector.load %arg2[%c0_2, %c0_3] : memref<64x48xf32, #tpu.memory_space<vmem>>, vector<64x48xf32>
    %c0_4 = arith.constant 0 : index
    %c0_5 = arith.constant 0 : index
    %5 = vector.load %arg3[%c0_4, %c0_5] : memref<64x16xf32, #tpu.memory_space<vmem>>, vector<64x16xf32>
    %c0_6 = arith.constant 0 : index
    %c0_7 = arith.constant 0 : index
    %c0_8 = arith.constant 0 : index
    %6 = vector.load %arg9[%c0_6, %c0_7, %c0_8] : memref<1x6x48xf32, #tpu.memory_space<vmem>>, vector<1x1x48xf32>
    %7 = vector.shape_cast %6 : vector<1x1x48xf32> to vector<1x48xf32>
    %c0_9 = arith.constant 0 : index
    %c1 = arith.constant 1 : index
    %c0_10 = arith.constant 0 : index
    %8 = vector.load %arg9[%c0_9, %c1, %c0_10] : memref<1x6x48xf32, #tpu.memory_space<vmem>>, vector<1x1x48xf32>
    %9 = vector.shape_cast %8 : vector<1x1x48xf32> to vector<1x48xf32>
    %c0_11 = arith.constant 0 : index
    %c2 = arith.constant 2 : index
    %c0_12 = arith.constant 0 : index
    %10 = vector.load %arg9[%c0_11, %c2, %c0_12] : memref<1x6x48xf32, #tpu.memory_space<vmem>>, vector<1x1x48xf32>
    %11 = vector.shape_cast %10 : vector<1x1x48xf32> to vector<1x48xf32>
    %c0_13 = arith.constant 0 : index
    %c3 = arith.constant 3 : index
    %c0_14 = arith.constant 0 : index
    %12 = vector.load %arg9[%c0_13, %c3, %c0_14] : memref<1x6x48xf32, #tpu.memory_space<vmem>>, vector<1x1x48xf32>
    %13 = vector.shape_cast %12 : vector<1x1x48xf32> to vector<1x48xf32>
    %c0_15 = arith.constant 0 : index
    %c4 = arith.constant 4 : index
    %c0_16 = arith.constant 0 : index
    %14 = vector.load %arg9[%c0_15, %c4, %c0_16] : memref<1x6x48xf32, #tpu.memory_space<vmem>>, vector<1x1x48xf32>
    %15 = vector.shape_cast %14 : vector<1x1x48xf32> to vector<1x48xf32>
    %c0_17 = arith.constant 0 : index
    %c5 = arith.constant 5 : index
    %c0_18 = arith.constant 0 : index
    %16 = vector.load %arg9[%c0_17, %c5, %c0_18] : memref<1x6x48xf32, #tpu.memory_space<vmem>>, vector<1x1x48xf32>
    %17 = vector.shape_cast %16 : vector<1x1x48xf32> to vector<1x48xf32>
    %18 = arith.truncf %3 : vector<16x48xf32> to vector<16x48xbf16>
    %c0_19 = arith.constant 0 : index
    %c0_20 = arith.constant 0 : index
    %c0_21 = arith.constant 0 : index
    %19 = vector.load %arg4[%c0_19, %c0_20, %c0_21] : memref<1x48x384xbf16, #tpu.memory_space<vmem>>, vector<1x48x384xbf16>
    %20 = vector.shape_cast %19 : vector<1x48x384xbf16> to vector<48x384xbf16>
    %cst = arith.constant dense<0.000000e+00> : vector<16x384xf32>
    %21 = tpu.matmul %18, %20, %cst {dimension_numbers = #tpu.dot_dimension_numbers<[1], [0], [0], [1], [0, 0, 1, 1], [], []>} : vector<16x48xbf16>, vector<48x384xbf16>, vector<16x384xf32> -> vector<16x384xf32>
    %c0_22 = arith.constant 0 : index
    %c0_23 = arith.constant 0 : index
    %c0_24 = arith.constant 0 : index
    %22 = vector.load %arg8[%c0_22, %c0_23, %c0_24] : memref<1x1x384xf32, #tpu.memory_space<vmem>>, vector<1x1x384xf32>
    %23 = vector.shape_cast %22 : vector<1x1x384xf32> to vector<1x384xf32>
    %24 = vector.broadcast %23 : vector<1x384xf32> to vector<16x384xf32>
    %25 = arith.addf %21, %24 : vector<16x384xf32>
    %26 = vector.extract_strided_slice %25 {offsets = [0, 0], sizes = [16, 48], strides = [1, 1]} : vector<16x384xf32> to vector<16x48xf32>
    %27 = vector.extract_strided_slice %25 {offsets = [0, 128], sizes = [16, 48], strides = [1, 1]} : vector<16x384xf32> to vector<16x48xf32>
    %28 = vector.extract_strided_slice %25 {offsets = [0, 256], sizes = [16, 48], strides = [1, 1]} : vector<16x384xf32> to vector<16x48xf32>
    %29 = tpu.concatenate %26, %26, %26, %26 in 0 : vector<16x48xf32>, vector<16x48xf32>, vector<16x48xf32>, vector<16x48xf32> -> vector<64x48xf32>
    %30 = arith.mulf %29, %4 : vector<64x48xf32>
    %31 = arith.truncf %30 : vector<64x48xf32> to vector<64x48xbf16>
    %32 = arith.truncf %27 : vector<16x48xf32> to vector<16x48xbf16>
    %cst_25 = arith.constant dense<0.000000e+00> : vector<64x16xf32>
    %33 = tpu.matmul %31, %32, %cst_25 {dimension_numbers = #tpu.dot_dimension_numbers<[1], [1], [0], [0], [0, 0, 1, 0], [], []>} : vector<64x48xbf16>, vector<16x48xbf16>, vector<64x16xf32> -> vector<64x16xf32>
    %34 = arith.addf %33, %5 : vector<64x16xf32>
    %cst_26 = arith.constant dense<0xFF800000> : vector<64xf32>
    %35 = vector.multi_reduction <maximumf>, %34, %cst_26 [1] : vector<64x16xf32> to vector<64xf32>
    %36 = vector.shape_cast %35 : vector<64xf32> to vector<64x1xf32>
    %37 = vector.broadcast %36 : vector<64x1xf32> to vector<64x16xf32>
    %38 = arith.subf %34, %37 : vector<64x16xf32>
    %39 = math.exp %38 : vector<64x16xf32>
    %cst_27 = arith.constant dense<0.000000e+00> : vector<64xf32>
    %40 = vector.multi_reduction <add>, %39, %cst_27 [1] : vector<64x16xf32> to vector<64xf32>
    %41 = vector.shape_cast %40 : vector<64xf32> to vector<64x1xf32>
    %42 = tpu.reciprocal %41 {approx = true} : vector<64x1xf32> -> vector<64x1xf32>
    %43 = vector.broadcast %42 : vector<64x1xf32> to vector<64x16xf32>
    %44 = arith.mulf %39, %43 : vector<64x16xf32>
    %45 = arith.truncf %44 : vector<64x16xf32> to vector<64x16xbf16>
    %46 = arith.truncf %28 : vector<16x48xf32> to vector<16x48xbf16>
    %cst_28 = arith.constant dense<0.000000e+00> : vector<64x48xf32>
    %47 = tpu.matmul %45, %46, %cst_28 {dimension_numbers = #tpu.dot_dimension_numbers<[1], [0], [0], [1], [0, 0, 1, 1], [], []>} : vector<64x16xbf16>, vector<16x48xbf16>, vector<64x48xf32> -> vector<64x48xf32>
    %48 = arith.mulf %47, %4 : vector<64x48xf32>
    %49 = vector.extract_strided_slice %48 {offsets = [0, 0], sizes = [16, 48], strides = [1, 1]} : vector<64x48xf32> to vector<16x48xf32>
    %50 = vector.extract_strided_slice %48 {offsets = [16, 0], sizes = [16, 48], strides = [1, 1]} : vector<64x48xf32> to vector<16x48xf32>
    %51 = arith.addf %49, %50 : vector<16x48xf32>
    %52 = vector.extract_strided_slice %48 {offsets = [32, 0], sizes = [16, 48], strides = [1, 1]} : vector<64x48xf32> to vector<16x48xf32>
    %53 = arith.addf %51, %52 : vector<16x48xf32>
    %54 = vector.extract_strided_slice %48 {offsets = [48, 0], sizes = [16, 48], strides = [1, 1]} : vector<64x48xf32> to vector<16x48xf32>
    %55 = arith.addf %53, %54 : vector<16x48xf32>
    %56 = arith.truncf %55 : vector<16x48xf32> to vector<16x48xbf16>
    %c0_29 = arith.constant 0 : index
    %c0_30 = arith.constant 0 : index
    %c0_31 = arith.constant 0 : index
    %57 = vector.load %arg5[%c0_29, %c0_30, %c0_31] : memref<1x48x48xbf16, #tpu.memory_space<vmem>>, vector<1x48x48xbf16>
    %58 = vector.shape_cast %57 : vector<1x48x48xbf16> to vector<48x48xbf16>
    %cst_32 = arith.constant dense<0.000000e+00> : vector<16x48xf32>
    %59 = tpu.matmul %56, %58, %cst_32 {dimension_numbers = #tpu.dot_dimension_numbers<[1], [0], [0], [1], [0, 0, 1, 1], [], []>} : vector<16x48xbf16>, vector<48x48xbf16>, vector<16x48xf32> -> vector<16x48xf32>
    %60 = vector.broadcast %7 : vector<1x48xf32> to vector<16x48xf32>
    %61 = arith.addf %59, %60 : vector<16x48xf32>
    %62 = arith.addf %3, %61 : vector<16x48xf32>
    %cst_33 = arith.constant dense<0.000000e+00> : vector<16xf32>
    %63 = vector.multi_reduction <add>, %62, %cst_33 [1] : vector<16x48xf32> to vector<16xf32>
    %64 = vector.shape_cast %63 : vector<16xf32> to vector<16x1xf32>
    %cst_34 = arith.constant 4.800000e+01 : f32
    %65 = vector.broadcast %cst_34 : f32 to vector<16x1xf32>
    %66 = arith.divf %64, %65 : vector<16x1xf32>
    %67 = vector.broadcast %66 : vector<16x1xf32> to vector<16x48xf32>
    %68 = arith.subf %62, %67 : vector<16x48xf32>
    %69 = arith.mulf %68, %68 : vector<16x48xf32>
    %cst_35 = arith.constant dense<0.000000e+00> : vector<16xf32>
    %70 = vector.multi_reduction <add>, %69, %cst_35 [1] : vector<16x48xf32> to vector<16xf32>
    %71 = vector.shape_cast %70 : vector<16xf32> to vector<16x1xf32>
    %cst_36 = arith.constant 4.800000e+01 : f32
    %72 = vector.broadcast %cst_36 : f32 to vector<16x1xf32>
    %73 = arith.divf %71, %72 : vector<16x1xf32>
    %cst_37 = arith.constant 9.99999974E-6 : f32
    %74 = vector.broadcast %cst_37 : f32 to vector<16x1xf32>
    %75 = arith.addf %73, %74 : vector<16x1xf32>
    %76 = math.rsqrt %75 : vector<16x1xf32>
    %77 = vector.broadcast %76 : vector<16x1xf32> to vector<16x48xf32>
    %78 = arith.mulf %68, %77 : vector<16x48xf32>
    %79 = vector.broadcast %11 : vector<1x48xf32> to vector<16x48xf32>
    %80 = arith.mulf %78, %79 : vector<16x48xf32>
    %81 = vector.broadcast %13 : vector<1x48xf32> to vector<16x48xf32>
    %82 = arith.addf %80, %81 : vector<16x48xf32>
    %83 = arith.truncf %82 : vector<16x48xf32> to vector<16x48xbf16>
    %cst_38 = arith.constant 0.000000e+00 : f32
    %84 = vector.broadcast %cst_38 : f32 to vector<16x48xf32>
    %c0_39 = arith.constant 0 : index
    %c0_40 = arith.constant 0 : index
    %c0_41 = arith.constant 0 : index
    %85 = vector.load %arg6[%c0_39, %c0_40, %c0_41] : memref<1x48x2048xbf16, #tpu.memory_space<vmem>>, vector<1x48x512xbf16>
    %86 = vector.shape_cast %85 : vector<1x48x512xbf16> to vector<48x512xbf16>
    %cst_42 = arith.constant dense<0.000000e+00> : vector<16x512xf32>
    %87 = tpu.matmul %83, %86, %cst_42 {dimension_numbers = #tpu.dot_dimension_numbers<[1], [0], [0], [1], [0, 0, 1, 1], [], []>} : vector<16x48xbf16>, vector<48x512xbf16>, vector<16x512xf32> -> vector<16x512xf32>
    %c0_43 = arith.constant 0 : index
    %c0_44 = arith.constant 0 : index
    %c0_45 = arith.constant 0 : index
    %88 = vector.load %arg10[%c0_43, %c0_44, %c0_45] : memref<1x1x2048xf32, #tpu.memory_space<vmem>>, vector<1x1x512xf32>
    %89 = vector.shape_cast %88 : vector<1x1x512xf32> to vector<1x512xf32>
    %90 = vector.broadcast %89 : vector<1x512xf32> to vector<16x512xf32>
    %91 = arith.addf %87, %90 : vector<16x512xf32>
    %cst_46 = arith.constant 0.000000e+00 : f32
    %92 = vector.broadcast %cst_46 : f32 to vector<16x512xf32>
    %93 = arith.maximumf %91, %92 : vector<16x512xf32>
    %94 = arith.truncf %93 : vector<16x512xf32> to vector<16x512xbf16>
    %c0_47 = arith.constant 0 : index
    %c0_48 = arith.constant 0 : index
    %c0_49 = arith.constant 0 : index
    %95 = vector.load %arg7[%c0_47, %c0_48, %c0_49] : memref<1x2048x48xbf16, #tpu.memory_space<vmem>>, vector<1x512x48xbf16>
    %96 = vector.shape_cast %95 : vector<1x512x48xbf16> to vector<512x48xbf16>
    %cst_50 = arith.constant dense<0.000000e+00> : vector<16x48xf32>
    %97 = tpu.matmul %94, %96, %cst_50 {dimension_numbers = #tpu.dot_dimension_numbers<[1], [0], [0], [1], [0, 0, 1, 1], [], []>} : vector<16x512xbf16>, vector<512x48xbf16>, vector<16x48xf32> -> vector<16x48xf32>
    %98 = arith.addf %84, %97 : vector<16x48xf32>
    %c0_51 = arith.constant 0 : index
    %c0_52 = arith.constant 0 : index
    %c512 = arith.constant 512 : index
    %99 = vector.load %arg6[%c0_51, %c0_52, %c512] : memref<1x48x2048xbf16, #tpu.memory_space<vmem>>, vector<1x48x512xbf16>
    %100 = vector.shape_cast %99 : vector<1x48x512xbf16> to vector<48x512xbf16>
    %cst_53 = arith.constant dense<0.000000e+00> : vector<16x512xf32>
    %101 = tpu.matmul %83, %100, %cst_53 {dimension_numbers = #tpu.dot_dimension_numbers<[1], [0], [0], [1], [0, 0, 1, 1], [], []>} : vector<16x48xbf16>, vector<48x512xbf16>, vector<16x512xf32> -> vector<16x512xf32>
    %c0_54 = arith.constant 0 : index
    %c0_55 = arith.constant 0 : index
    %c512_56 = arith.constant 512 : index
    %102 = vector.load %arg10[%c0_54, %c0_55, %c512_56] : memref<1x1x2048xf32, #tpu.memory_space<vmem>>, vector<1x1x512xf32>
    %103 = vector.shape_cast %102 : vector<1x1x512xf32> to vector<1x512xf32>
    %104 = vector.broadcast %103 : vector<1x512xf32> to vector<16x512xf32>
    %105 = arith.addf %101, %104 : vector<16x512xf32>
    %cst_57 = arith.constant 0.000000e+00 : f32
    %106 = vector.broadcast %cst_57 : f32 to vector<16x512xf32>
    %107 = arith.maximumf %105, %106 : vector<16x512xf32>
    %108 = arith.truncf %107 : vector<16x512xf32> to vector<16x512xbf16>
    %c0_58 = arith.constant 0 : index
    %c512_59 = arith.constant 512 : index
    %c0_60 = arith.constant 0 : index
    %109 = vector.load %arg7[%c0_58, %c512_59, %c0_60] : memref<1x2048x48xbf16, #tpu.memory_space<vmem>>, vector<1x512x48xbf16>
    %110 = vector.shape_cast %109 : vector<1x512x48xbf16> to vector<512x48xbf16>
    %cst_61 = arith.constant dense<0.000000e+00> : vector<16x48xf32>
    %111 = tpu.matmul %108, %110, %cst_61 {dimension_numbers = #tpu.dot_dimension_numbers<[1], [0], [0], [1], [0, 0, 1, 1], [], []>} : vector<16x512xbf16>, vector<512x48xbf16>, vector<16x48xf32> -> vector<16x48xf32>
    %112 = arith.addf %98, %111 : vector<16x48xf32>
    %c0_62 = arith.constant 0 : index
    %c0_63 = arith.constant 0 : index
    %c1024 = arith.constant 1024 : index
    %113 = vector.load %arg6[%c0_62, %c0_63, %c1024] : memref<1x48x2048xbf16, #tpu.memory_space<vmem>>, vector<1x48x512xbf16>
    %114 = vector.shape_cast %113 : vector<1x48x512xbf16> to vector<48x512xbf16>
    %cst_64 = arith.constant dense<0.000000e+00> : vector<16x512xf32>
    %115 = tpu.matmul %83, %114, %cst_64 {dimension_numbers = #tpu.dot_dimension_numbers<[1], [0], [0], [1], [0, 0, 1, 1], [], []>} : vector<16x48xbf16>, vector<48x512xbf16>, vector<16x512xf32> -> vector<16x512xf32>
    %c0_65 = arith.constant 0 : index
    %c0_66 = arith.constant 0 : index
    %c1024_67 = arith.constant 1024 : index
    %116 = vector.load %arg10[%c0_65, %c0_66, %c1024_67] : memref<1x1x2048xf32, #tpu.memory_space<vmem>>, vector<1x1x512xf32>
    %117 = vector.shape_cast %116 : vector<1x1x512xf32> to vector<1x512xf32>
    %118 = vector.broadcast %117 : vector<1x512xf32> to vector<16x512xf32>
    %119 = arith.addf %115, %118 : vector<16x512xf32>
    %cst_68 = arith.constant 0.000000e+00 : f32
    %120 = vector.broadcast %cst_68 : f32 to vector<16x512xf32>
    %121 = arith.maximumf %119, %120 : vector<16x512xf32>
    %122 = arith.truncf %121 : vector<16x512xf32> to vector<16x512xbf16>
    %c0_69 = arith.constant 0 : index
    %c1024_70 = arith.constant 1024 : index
    %c0_71 = arith.constant 0 : index
    %123 = vector.load %arg7[%c0_69, %c1024_70, %c0_71] : memref<1x2048x48xbf16, #tpu.memory_space<vmem>>, vector<1x512x48xbf16>
    %124 = vector.shape_cast %123 : vector<1x512x48xbf16> to vector<512x48xbf16>
    %cst_72 = arith.constant dense<0.000000e+00> : vector<16x48xf32>
    %125 = tpu.matmul %122, %124, %cst_72 {dimension_numbers = #tpu.dot_dimension_numbers<[1], [0], [0], [1], [0, 0, 1, 1], [], []>} : vector<16x512xbf16>, vector<512x48xbf16>, vector<16x48xf32> -> vector<16x48xf32>
    %126 = arith.addf %112, %125 : vector<16x48xf32>
    %c0_73 = arith.constant 0 : index
    %c0_74 = arith.constant 0 : index
    %c1536 = arith.constant 1536 : index
    %127 = vector.load %arg6[%c0_73, %c0_74, %c1536] : memref<1x48x2048xbf16, #tpu.memory_space<vmem>>, vector<1x48x512xbf16>
    %128 = vector.shape_cast %127 : vector<1x48x512xbf16> to vector<48x512xbf16>
    %cst_75 = arith.constant dense<0.000000e+00> : vector<16x512xf32>
    %129 = tpu.matmul %83, %128, %cst_75 {dimension_numbers = #tpu.dot_dimension_numbers<[1], [0], [0], [1], [0, 0, 1, 1], [], []>} : vector<16x48xbf16>, vector<48x512xbf16>, vector<16x512xf32> -> vector<16x512xf32>
    %c0_76 = arith.constant 0 : index
    %c0_77 = arith.constant 0 : index
    %c1536_78 = arith.constant 1536 : index
    %130 = vector.load %arg10[%c0_76, %c0_77, %c1536_78] : memref<1x1x2048xf32, #tpu.memory_space<vmem>>, vector<1x1x512xf32>
    %131 = vector.shape_cast %130 : vector<1x1x512xf32> to vector<1x512xf32>
    %132 = vector.broadcast %131 : vector<1x512xf32> to vector<16x512xf32>
    %133 = arith.addf %129, %132 : vector<16x512xf32>
    %cst_79 = arith.constant 0.000000e+00 : f32
    %134 = vector.broadcast %cst_79 : f32 to vector<16x512xf32>
    %135 = arith.maximumf %133, %134 : vector<16x512xf32>
    %136 = arith.truncf %135 : vector<16x512xf32> to vector<16x512xbf16>
    %c0_80 = arith.constant 0 : index
    %c1536_81 = arith.constant 1536 : index
    %c0_82 = arith.constant 0 : index
    %137 = vector.load %arg7[%c0_80, %c1536_81, %c0_82] : memref<1x2048x48xbf16, #tpu.memory_space<vmem>>, vector<1x512x48xbf16>
    %138 = vector.shape_cast %137 : vector<1x512x48xbf16> to vector<512x48xbf16>
    %cst_83 = arith.constant dense<0.000000e+00> : vector<16x48xf32>
    %139 = tpu.matmul %136, %138, %cst_83 {dimension_numbers = #tpu.dot_dimension_numbers<[1], [0], [0], [1], [0, 0, 1, 1], [], []>} : vector<16x512xbf16>, vector<512x48xbf16>, vector<16x48xf32> -> vector<16x48xf32>
    %140 = arith.addf %126, %139 : vector<16x48xf32>
    %141 = arith.addf %82, %140 : vector<16x48xf32>
    %142 = vector.broadcast %9 : vector<1x48xf32> to vector<16x48xf32>
    %143 = arith.addf %141, %142 : vector<16x48xf32>
    %cst_84 = arith.constant dense<0.000000e+00> : vector<16xf32>
    %144 = vector.multi_reduction <add>, %143, %cst_84 [1] : vector<16x48xf32> to vector<16xf32>
    %145 = vector.shape_cast %144 : vector<16xf32> to vector<16x1xf32>
    %cst_85 = arith.constant 4.800000e+01 : f32
    %146 = vector.broadcast %cst_85 : f32 to vector<16x1xf32>
    %147 = arith.divf %145, %146 : vector<16x1xf32>
    %148 = vector.broadcast %147 : vector<16x1xf32> to vector<16x48xf32>
    %149 = arith.subf %143, %148 : vector<16x48xf32>
    %150 = arith.mulf %149, %149 : vector<16x48xf32>
    %cst_86 = arith.constant dense<0.000000e+00> : vector<16xf32>
    %151 = vector.multi_reduction <add>, %150, %cst_86 [1] : vector<16x48xf32> to vector<16xf32>
    %152 = vector.shape_cast %151 : vector<16xf32> to vector<16x1xf32>
    %cst_87 = arith.constant 4.800000e+01 : f32
    %153 = vector.broadcast %cst_87 : f32 to vector<16x1xf32>
    %154 = arith.divf %152, %153 : vector<16x1xf32>
    %cst_88 = arith.constant 9.99999974E-6 : f32
    %155 = vector.broadcast %cst_88 : f32 to vector<16x1xf32>
    %156 = arith.addf %154, %155 : vector<16x1xf32>
    %157 = math.rsqrt %156 : vector<16x1xf32>
    %158 = vector.broadcast %157 : vector<16x1xf32> to vector<16x48xf32>
    %159 = arith.mulf %149, %158 : vector<16x48xf32>
    %160 = vector.broadcast %15 : vector<1x48xf32> to vector<16x48xf32>
    %161 = arith.mulf %159, %160 : vector<16x48xf32>
    %162 = vector.broadcast %17 : vector<1x48xf32> to vector<16x48xf32>
    %163 = arith.addf %161, %162 : vector<16x48xf32>
    %c0_89 = arith.constant 0 : index
    %c0_90 = arith.constant 0 : index
    %164 = vector.load %arg14[%c0_89, %c0_90] : memref<16x48xf32, #tpu.memory_space<vmem>>, vector<16x48xf32>
    tpu.vector_store %arg14[%c0_89, %c0_90], %163 {strides = array<i32>} : memref<16x48xf32, #tpu.memory_space<vmem>>, vector<16x48xf32>,
    %c1_i32 = arith.constant 1 : i32
    %165 = arith.cmpi eq, %arg0, %c1_i32 : i32
    %166 = arith.extui %165 : i1 to i32
    %c0_i32_91 = arith.constant 0 : i32
    %167 = arith.cmpi ne, %166, %c0_i32_91 : i32
    scf.if %167 {
      %168 = arith.truncf %163 : vector<16x48xf32> to vector<16x48xbf16>
      %c0_92 = arith.constant 0 : index
      %c0_93 = arith.constant 0 : index
      %169 = vector.load %arg11[%c0_92, %c0_93] : memref<48x128xbf16, #tpu.memory_space<vmem>>, vector<48x128xbf16>
      %cst_94 = arith.constant dense<0.000000e+00> : vector<16x128xf32>
      %170 = tpu.matmul %168, %169, %cst_94 {dimension_numbers = #tpu.dot_dimension_numbers<[1], [0], [0], [1], [0, 0, 1, 1], [], []>} : vector<16x48xbf16>, vector<48x128xbf16>, vector<16x128xf32> -> vector<16x128xf32>
      %c0_95 = arith.constant 0 : index
      %c0_96 = arith.constant 0 : index
      %171 = vector.load %arg12[%c0_95, %c0_96] : memref<1x128xf32, #tpu.memory_space<vmem>>, vector<1x128xf32>
      %172 = vector.broadcast %171 : vector<1x128xf32> to vector<16x128xf32>
      %173 = arith.addf %170, %172 : vector<16x128xf32>
      %c0_97 = arith.constant 0 : index
      %c0_98 = arith.constant 0 : index
      %174 = vector.load %arg13[%c0_97, %c0_98] : memref<16x128xf32, #tpu.memory_space<vmem>>, vector<16x128xf32>
      tpu.vector_store %arg13[%c0_97, %c0_98], %173 {strides = array<i32>} : memref<16x128xf32, #tpu.memory_space<vmem>>, vector<16x128xf32>,
    } else {
    }
    return
  }
  func.func @transform_0(%arg0: i32) -> (i32, i32) {
    %c0_i32 = arith.constant 0 : i32
    %c0_i32_0 = arith.constant 0 : i32
    %c0_i32_1 = arith.constant 0 : i32
    return %c0_i32, %c0_i32_0 : i32, i32
  }
  func.func @transform_1(%arg0: i32) -> (i32, i32) {
    %c0_i32 = arith.constant 0 : i32
    %c0_i32_0 = arith.constant 0 : i32
    %c0_i32_1 = arith.constant 0 : i32
    return %c0_i32, %c0_i32_0 : i32, i32
  }
  func.func @transform_2(%arg0: i32) -> (i32, i32) {
    %c0_i32 = arith.constant 0 : i32
    %c0_i32_0 = arith.constant 0 : i32
    %c0_i32_1 = arith.constant 0 : i32
    return %c0_i32, %c0_i32_0 : i32, i32
  }
  func.func @transform_3(%arg0: i32) -> (i32, i32, i32) {
    %c0_i32 = arith.constant 0 : i32
    %c0_i32_0 = arith.constant 0 : i32
    %c0_i32_1 = arith.constant 0 : i32
    return %arg0, %c0_i32, %c0_i32_0 : i32, i32, i32
  }
  func.func @transform_4(%arg0: i32) -> (i32, i32, i32) {
    %c0_i32 = arith.constant 0 : i32
    %c0_i32_0 = arith.constant 0 : i32
    %c0_i32_1 = arith.constant 0 : i32
    return %arg0, %c0_i32, %c0_i32_0 : i32, i32, i32
  }
  func.func @transform_5(%arg0: i32) -> (i32, i32, i32) {
    %c0_i32 = arith.constant 0 : i32
    %c0_i32_0 = arith.constant 0 : i32
    %c0_i32_1 = arith.constant 0 : i32
    return %arg0, %c0_i32, %c0_i32_0 : i32, i32, i32
  }
  func.func @transform_6(%arg0: i32) -> (i32, i32, i32) {
    %c0_i32 = arith.constant 0 : i32
    %c0_i32_0 = arith.constant 0 : i32
    %c0_i32_1 = arith.constant 0 : i32
    return %arg0, %c0_i32, %c0_i32_0 : i32, i32, i32
  }
  func.func @transform_7(%arg0: i32) -> (i32, i32, i32) {
    %c0_i32 = arith.constant 0 : i32
    %c0_i32_0 = arith.constant 0 : i32
    %c0_i32_1 = arith.constant 0 : i32
    return %arg0, %c0_i32, %c0_i32_0 : i32, i32, i32
  }
  func.func @transform_8(%arg0: i32) -> (i32, i32, i32) {
    %c0_i32 = arith.constant 0 : i32
    %c0_i32_0 = arith.constant 0 : i32
    %c0_i32_1 = arith.constant 0 : i32
    return %arg0, %c0_i32, %c0_i32_0 : i32, i32, i32
  }
  func.func @transform_9(%arg0: i32) -> (i32, i32, i32) {
    %c0_i32 = arith.constant 0 : i32
    %c0_i32_0 = arith.constant 0 : i32
    %c0_i32_1 = arith.constant 0 : i32
    return %arg0, %c0_i32, %c0_i32_0 : i32, i32, i32
  }
  func.func @transform_10(%arg0: i32) -> (i32, i32) {
    %c0_i32 = arith.constant 0 : i32
    %c0_i32_0 = arith.constant 0 : i32
    %c0_i32_1 = arith.constant 0 : i32
    return %c0_i32, %c0_i32_0 : i32, i32
  }
  func.func @transform_11(%arg0: i32) -> (i32, i32) {
    %c0_i32 = arith.constant 0 : i32
    %c0_i32_0 = arith.constant 0 : i32
    %c0_i32_1 = arith.constant 0 : i32
    return %c0_i32, %c0_i32_0 : i32, i32
  }
  func.func @transform_12(%arg0: i32) -> (i32, i32) {
    %c0_i32 = arith.constant 0 : i32
    %c0_i32_0 = arith.constant 0 : i32
    %c0_i32_1 = arith.constant 0 : i32
    return %c0_i32, %c0_i32_0 : i32, i32
  }
}

</mosaic_0001>

<bundles_post_ra>
// kernel: tpu_custom_call.1
= control target key start
LH: loop header
LB: loop body
LE: loop exit
PB: predicated region body
PF: predicated region fallthrough
CT: control target
= control target key end

     0   :  { %s4828_s0 = inlined_call_operand.vmem [shape: f32[16,48], index: 0, kind: input, shape index: {}]   ;;  %s4829_s1 = inlined_call_operand.vmem [shape: f32[64,48], index: 1, kind: input, shape index: {}]   ;;  %s4830_s2 = inlined_call_operand.vmem [shape: f32[64,16], index: 2, kind: input, shape index: {}]   ;;  %s4831_s3 = inlined_call_operand.vmem [shape: bf16[2,48,384], index: 3, kind: input, shape index: {}]   ;;  %s4832_s4 = inlined_call_operand.vmem [shape: bf16[2,48,48], index: 4, kind: input, shape index: {}]   ;;  %s4833_s5 = inlined_call_operand.vmem [shape: bf16[2,48,2048], index: 5, kind: input, shape index: {}]   ;;  %s4834_s6 = inlined_call_operand.vmem [shape: bf16[2,2048,48], index: 6, kind: input, shape index: {}]   ;;  %s4835_s7 = inlined_call_operand.vmem [shape: f32[2,1,384], index: 7, kind: input, shape index: {}]   ;;  %s4836_s8 = inlined_call_operand.vmem [shape: f32[2,6,48], index: 8, kind: input, shape index: {}]   ;;  %s4837_s9 = inlined_call_operand.vmem [shape: f32[2,1,2048], index: 9, kind: input, shape index: {}]   ;;  %s4838_s10 = inlined_call_operand.vmem [shape: bf16[48,128], index: 10, kind: input, shape index: {}]   ;;  %s4839_s11 = inlined_call_operand.vmem [shape: f32[1,128], index: 11, kind: input, shape index: {}]   ;;  %s4840_s12 = inlined_call_operand.hbm [shape: f32[16,128], index: 12, kind: output, shape index: {}]  }
   0x1   :  { %4843 = sst [smem:[#allocation7_spill]] %s4831_s3 }
   0x2   :  { %4844 = sst [smem:[#allocation8_spill]] %s4834_s6 }
   0x3   :  { %4845 = sst [smem:[#allocation9_spill]] %s4840_s12 }
   0x4   :  { %17 = vsyncpa [#allocation4], 0  ;;  %s4291_s21 = smov 0  }
   0x5 LB: > { %4846 = sst [smem:[#allocation6_spill]] %s4216_s21  ;;  %s4297_s22 = sadd.s32 4294967295, %s4216_s21   ;;  %s4216_s21 = sphi %s4291_s21, %s23_s21  }
   0x6   : > { %p3484_p0 = scmp.ge.s32.totalorder %s4216_s21, 1  ;;  %p415_p1 = scmp.lt.s32.totalorder %s4216_s21, 3 }
   0x8   : > { %p416_p2 = pnand %p3484_p0, %p415_p1 }
   0x9   : > { %p479_p3 = scmp.lt.s32.totalorder (!%p416_p2), %s4297_s22, 1  ;;  %s4847_s6 = sld [smem:[#allocation8_spill]] (!%p416_p2) }
   0xa   : > { %419 = sbr.rel (%p416_p2) target bundleno = 3098 (0xc1a), region = 68  ;;  %s4848_s3 = sld [smem:[#allocation7_spill]] (!%p416_p2) }
   0xb   : > { %p3492_p4 = scmp.ne.s32.totalorder (!%p416_p2), %s4297_s22, 0 }
  0x11   : > { %s480_s23 = scalar_select %p479_p3, %s4297_s22, 1 }
  0x12   : > { %v516_v0 = vld [vmem:[%s4828_s0] sm:$0xff] (!%p3492_p4)  ;;  %vm518_vm0 = vcmask (!%p3492_p4), 392192   ;;  %v517_v1 = vld [vmem:[%s4828_s0 + $0x8] sm:$0xff] (!%p3492_p4) }
  0x13   : > { %s3966_s24 = smul.u32 72, %s480_s23  ;;  %s3716_s25 = sshll.u32 %s480_s23, 10  ;;  %519 = vst.msk [vmem:[#allocation2] sm:$0xff] (!%p3492_p4), %vm518_vm0, %v516_v0  ;;  %520 = vst.msk [vmem:[#allocation2 + $0x8] sm:$0xff] (!%p3492_p4), %vm518_vm0, %v517_v1 }
  0x14   : > { %s3967_s26 = smul.u32 24, %s480_s23  ;;  %s4306_s29 = scalar_lea.vmem %s4847_s6, %s3716_s25 }
  0x15   : > { %s4311_s14 = scalar_lea.vmem %s4848_s3, %s3966_s24  ;;  %s3968_s15 = smul.u32 384, %s480_s23 }
  0x16   : > { %s4316_s18 = scalar_lea.vmem %s4832_s4, %s3967_s26  ;;  %s3969_s19 = smul.u32 3, %s480_s23 }
  0x17   : > { %s4321_s12 = scalar_lea.vmem %s4833_s5, %s3968_s15  ;;  %s3490_s27 = sshll.u32 %s480_s23, 3 }
  0x18   : > { %s4326_s6 = scalar_lea.vmem %s4835_s7, %s3969_s19  ;;  %s4331_s13 = scalar_lea.vmem %s4836_s8, %s3490_s27 }
  0x19   : > { %s3491_s16 = sshll.u32 %s480_s23, 4  ;;  %515 = sbr.rel (%p3492_p4) target bundleno = 32 (0x20), region = 72 }
  0x1a   : > { %s4336_s3 = scalar_lea.vmem %s4837_s9, %s3491_s16 }
  0x20 PF: > { %v3992_v2 = vld [vmem:[%s4311_s14 + $0x4] ss:$12 sps:$4 sm:$0xff]   ;;  %v3994_v3 = vld [vmem:[%s4311_s14] ss:$12 sps:$4 sm:$0xff]   ;;  %v4218_v4 = vmov 0   ;;  %vm623_vm1 = vcmask 392192   ;;  %v560_v12 = vlaneseq }
  0x21   : > { %659 = vmatprep.mubr.bf16.mxu0 %v4218_v4  ;;  %627 = vmatprep.subr.bf16.mxu0 %v3992_v2  ;;  %v3995_v5 = vld [vmem:[%s4311_s14 + $0x1c] ss:$12 sps:$4 sm:$0xff]   ;;  %v3997_v6 = vld [vmem:[%s4311_s14 + $0x18] ss:$12 sps:$4 sm:$0xff]   ;;  %v3998_v7 = vld [vmem:[%s4311_s14 + $0x34] ss:$12 sps:$4 sm:$0xff]  }
  0x22   : > { %628 = vmatpush1.bf16.msra.mxu0 %v3994_v3  ;;  %v4000_v8 = vld [vmem:[%s4311_s14 + $0x30] ss:$12 sps:$4 sm:$0xff]   ;;  %v521_v9 = vld [vmem:[#allocation2] sm:$0xff]  ;;  %v522_v10 = vld [vmem:[#allocation2 + $0x8] sm:$0xff]  ;;  %v4353_v13 = vshrl.u32 %v560_v12, 7  ;;  %v4219_v50 = vmov 0.0  }
  0x23   : > { %629 = vmatprep.subr.bf16.mxu0 %v3995_v5  ;;  %v545_v11 = vpack.c.bf16 %v522_v10, %v521_v9  ;;  %v4359_v15 = vld [vmem:[%s4326_s6] sm:$0x7]  ;;  %v4376_v21 = vld [vmem:[%s4829_s1 + $0x10] sm:$0xff]  ;;  %v4391_v26 = vld [vmem:[%s4829_s1 + $0x8] sm:$0xff]  ;;  %3915 = vmatprep.subr.bf16.mxu1 %v4219_v50  ;;  %vm4220_vm2 = vmmov 0   ;;  %vm804_vm3 = vcmask 130048  }
  0x24   : > { %v4356_v14 = vsub.s32 0, %v4353_v13  ;;  %v4362_v16 = vsub.s32 1, %v4353_v13  ;;  %v4371_v20 = vld [vmem:[%s4829_s1] sm:$0xff]  ;;  %v4386_v25 = vld [vmem:[%s4829_s1 + $0x30] sm:$0xff]  ;;  %v4396_v28 = vld [vmem:[%s4829_s1 + $0x18] sm:$0xff]  ;;  %3921 = vmatprep.mubr.msk.bf16.mxu1 %vm4220_vm2, %v4219_v50  ;;  %p3706_p5 = scmp.ne.s32.totalorder %s4297_s22, 1 }
  0x25   : > { %v4381_v24 = vld [vmem:[%s4829_s1 + $0x20] sm:$0xff]  ;;  %v4401_v29 = vld [vmem:[%s4829_s1 + $0x28] sm:$0xff]  ;;  %v4406_v30 = vld [vmem:[%s4829_s1 + $0x38] sm:$0xff]  ;;  %vm4222_vm4 = vmmov (!%p3706_p5), 0  }
  0x26   : > { %630 = vmatpush1.bf16.msra.mxu0 %v3997_v6  ;;  %v563_v17 = vrot.slane %v4359_v15, %v4356_v14  ;;  %v567_v19 = vrot.slane %v4359_v15, %v4362_v16  ;;  %v4001_v49 = vld [vmem:[%s4311_s14 + $0x8] ss:$12 sps:$4 sm:$0xff]   ;;  %v4002_v51 = vld [vmem:[%s4311_s14 + $0x20] ss:$12 sps:$4 sm:$0xff]   ;;  %v4003_v52 = vld [vmem:[%s4311_s14 + $0x38] ss:$12 sps:$4 sm:$0xff]  }
  0x27   : > { %631 = vmatprep.subr.bf16.mxu0 %v3998_v7  ;;  %3916 = vmatpush3.bf16.msra.mxu1 %v4001_v49  ;;  %v533_v53 = vld [vmem:[%s4830_s2 + $0x10] sm:$0xff]  ;;  %v531_v54 = vld [vmem:[%s4830_s2] sm:$0xff]  ;;  %v534_v56 = vld [vmem:[%s4830_s2 + $0x18] sm:$0xff] }
  0x28   : > { %3917 = vmatprep.subr.bf16.mxu1 %v4219_v50  ;;  %v532_v59 = vld [vmem:[%s4830_s2 + $0x8] sm:$0xff]  ;;  %v535_v5 = vld [vmem:[%s4830_s2 + $0x20] sm:$0xff] }
  0x29   : > { %v536_v10 = vld [vmem:[%s4830_s2 + $0x28] sm:$0xff] }
  0x2a   : > { %632 = vmatpush1.bf16.msra.mxu0 %v4000_v8  ;;  %v537_v8 = vld [vmem:[%s4830_s2 + $0x30] sm:$0xff] }
  0x2b   : > { %3918 = vmatpush3.bf16.msra.mxu1 %v4002_v51 }
  0x2c   : > { %3919 = vmatprep.subr.bf16.mxu1 %v4219_v50 }
  0x2d   : > { %3502 = vmatmul.mubr.msk.bf16.vlgmr.msra.gmra.mrb[0].mxu0 %vm623_vm1, %v545_v11 }
  0x2f   : > { %3920 = vmatpush3.bf16.msra.mxu1 %v4003_v52 }
  0x32   : > { %3922 = vmatmul.mubr.msk.bf16.vlgmr.msra.gmra.mrb[0].mxu1 %vm623_vm1, %v545_v11 }
 0x100   : > { %v661_v18 = vpop.f32.mrb[0].mxu0 }
 0x101   : > { %v662_v22 = vadd.f32 %v661_v18, %v563_v17  ;;  %v663_v23 = vpop.f32.mrb[1].mxu0 }
 0x102   : > { %v665_v27 = vpop.f32.mrb[2].mxu0  ;;  %v664_v32 = vadd.f32 %v663_v23, %v567_v19 }
 0x103   : > { %v667_v31 = vpop.f32.mrb[3].mxu0  ;;  %v666_v33 = vadd.f32 %v665_v27, %v563_v17  ;;  %v711_v35 = vmul.f32 %v662_v22, %v4371_v20  ;;  %v713_v36 = vmul.f32 %v662_v22, %v4376_v21  ;;  %v715_v37 = vmul.f32 %v662_v22, %v4381_v24  ;;  %v538_v17 = vld [vmem:[%s4830_s2 + $0x38] sm:$0xff] }
 0x104   : > { %v668_v34 = vadd.f32 %v667_v31, %v567_v19  ;;  %v717_v38 = vmul.f32 %v662_v22, %v4386_v25 }
 0x105   : > { %v712_v39 = vmul.f32 %v666_v33, %v4391_v26  ;;  %v714_v40 = vmul.f32 %v666_v33, %v4396_v28  ;;  %v716_v41 = vmul.f32 %v666_v33, %v4401_v29  ;;  %v718_v42 = vmul.f32 %v666_v33, %v4406_v30 }
 0x106   : > { %v723_v43 = vpack.c.bf16 %v668_v34, %v664_v32 }
 0x107   : > { %v720_v44 = vpack.c.bf16 %v714_v40, %v713_v36  ;;  %v719_v45 = vpack.c.bf16 %v712_v39, %v711_v35  ;;  %v721_v46 = vpack.c.bf16 %v716_v41, %v715_v37  ;;  %v722_v47 = vpack.c.bf16 %v718_v42, %v717_v38 }
 0x108   : > { %3965 = vmatprep.subr.msk.bf16.mxu0 %vm623_vm1, %v723_v43  ;;  %v737_v48 = vsel %vm623_vm1, %v723_v43, 0 }
 0x109   : > { %3926 = vmatpush3.bf16.xpose.msra.mxu0 %v737_v48  ;;  %3927 = vmatprep.mubr.msk.bf16.mxu0 %vm623_vm1, %v719_v45 }
 0x10a   : > { %3945 = vmatprep.subr.bf16.mxu0 %v4219_v50 }
 0x110   : > { %3928 = vmatmul.mubr.msk.bf16.vlgmr.msra.gmra.mrb[4].mxu0 %vm623_vm1, %v720_v44 }
 0x111   : > { %3931 = vmatprep.mubr.msk.bf16.mxu0 %vm623_vm1, %v721_v46 }
 0x118   : > { %3932 = vmatmul.mubr.msk.bf16.gmra.mrb[8].mxu0 %vm623_vm1, %v722_v47 }
 0x119   : > { %3951 = vmatprep.mubr.msk.bf16.mxu0 %vm4220_vm2, %v4219_v50 }
 0x1e3   : > { %v3929_v55 = vpop.f32.mrb[4].mxu0 }
 0x1e4   : > { %v782_v57 = vadd.f32 %v3929_v55, %v533_v53  ;;  %v773_v58 = vpop.f32.mrb[5].mxu0 }
 0x1e5   : > { %v774_v60 = vadd.f32 %v773_v58, %v531_v54  ;;  %v3930_v61 = vpop.f32.mrb[6].mxu0 }
 0x1e6   : > { %v785_v62 = vadd.f32 %v3930_v61, %v534_v56  ;;  %v776_v63 = vpop.f32.mrb[7].mxu0  ;;  %v811_v0 = vsel %vm804_vm3, %v782_v57, -inf }
 0x1e7   : > { %v777_v1 = vadd.f32 %v776_v63, %v532_v59  ;;  %812 = vmax.xlane.f32.xlu1 %v811_v0  ;;  %v805_v2 = vsel %vm804_vm3, %v774_v60, -inf }
 0x1e8   : > { %806 = vmax.xlane.f32.xlu0 %v805_v2  ;;  %v814_v3 = vsel %vm804_vm3, %v785_v62, -inf }
 0x1e9   : > { %v808_v7 = vsel %vm804_vm3, %v777_v1, -inf }
 0x1eb   : > { %815 = vmax.xlane.f32.xlu1 %v814_v3  ;;  %v3933_v6 = vpop.f32.mrb[8].mxu0 }
 0x1ec   : > { %v789_v9 = vpop.f32.mrb[9].mxu0  ;;  %809 = vmax.xlane.f32.xlu0 %v808_v7  ;;  %v798_v19 = vadd.f32 %v3933_v6, %v537_v8 }
 0x1ed   : > { %v790_v11 = vadd.f32 %v789_v9, %v535_v5  ;;  %v3934_v12 = vpop.f32.mrb[10].mxu0 }
 0x1ee   : > { %v792_v18 = vpop.f32.mrb[11].mxu0  ;;  %v801_v27 = vadd.f32 %v3934_v12, %v538_v17  ;;  %v823_v32 = vsel %vm804_vm3, %v798_v19, -inf  ;;  %v4473_v12 = vsub.s32 2, %v4353_v13  ;;  %v704_v17 = vpop.f32.mrb[0].mxu1 }
 0x1ef   : > { %v793_v22 = vadd.f32 %v792_v18, %v536_v10  ;;  %v817_v23 = vsel %vm804_vm3, %v790_v11, -inf }
 0x1f0   : > { %818 = vmax.xlane.f32.xlu0 %v817_v23  ;;  %v826_v33 = vsel %vm804_vm3, %v801_v27, -inf  ;;  %v571_v18 = vrot.slane %v4359_v15, %v4473_v12 }
 0x1f1   : > { %v820_v31 = vsel %vm804_vm3, %v793_v22, -inf }
 0x1f2   : > { %821 = vmax.xlane.f32.xlu1 %v820_v31  ;;  %v705_v23 = vadd.f32 %v704_v17, %v571_v18 }
 0x1f4   : > { %824 = vmax.xlane.f32.xlu0 %v823_v32 }
 0x1f6   : > { %827 = vmax.xlane.f32.xlu1 %v826_v33 }
 0x274   : > { %v813_v34 = vpop.xlane.xlu1 %812 }
 0x275   : > { %v831_v35 = vsub.f32 %v782_v57, %v813_v34  ;;  %v807_v36 = vpop.xlane.xlu0 %806 }
 0x276   : > { %v829_v37 = vsub.f32 %v774_v60, %v807_v36 }
 0x277   : > { %v841_v38 = vmul.f32 1.442695, %v831_v35 }
 0x278   : > { %v837_v39 = vmul.f32 1.442695, %v829_v37  ;;  %v816_v40 = vpop.xlane.xlu1 %815 }
 0x279   : > { %v832_v41 = vsub.f32 %v785_v62, %v816_v40  ;;  %v810_v42 = vpop.xlane.xlu0 %809 }
 0x27a   : > { %4135 = vpow2.f32 %v837_v39  ;;  %v830_v43 = vsub.f32 %v777_v1, %v810_v42 }
 0x27b   : > { %4137 = vpow2.f32 %v841_v38  ;;  %v843_v44 = vmul.f32 1.442695, %v832_v41 }
 0x27c   : > { %v839_v45 = vmul.f32 1.442695, %v830_v43 }
 0x27d   : > { %v819_v46 = vpop.xlane.xlu0 %818 }
 0x27e   : > { %4139 = vpow2.f32 %v839_v45  ;;  %v833_v47 = vsub.f32 %v790_v11, %v819_v46 }
 0x27f   : > { %v822_v48 = vpop.xlane.xlu1 %821  ;;  %4141 = vpow2.f32 %v843_v44 }
 0x280   : > { %v845_v49 = vmul.f32 1.442695, %v833_v47  ;;  %v834_v51 = vsub.f32 %v793_v22, %v822_v48 }
 0x281   : > { %v825_v52 = vpop.xlane.xlu0 %824 }
 0x282   : > { %4143 = vpow2.f32 %v845_v49  ;;  %v847_v53 = vmul.f32 1.442695, %v834_v51  ;;  %v835_v54 = vsub.f32 %v798_v19, %v825_v52  ;;  %v3923_v19 = vpop.f32.mrb[1].mxu1 }
 0x283   : > { %v828_v55 = vpop.xlane.xlu1 %827  ;;  %v707_v22 = vpop.f32.mrb[2].mxu1 }
 0x284   : > { %v4136_v56 = vpop.eup %4135  ;;  %4145 = vpow2.f32 %v847_v53  ;;  %v849_v57 = vmul.f32 1.442695, %v835_v54  ;;  %v836_v58 = vsub.f32 %v801_v27, %v828_v55  ;;  %v708_v27 = vadd.f32 %v707_v22, %v571_v18  ;;  %v3924_v31 = vpop.f32.mrb[3].mxu1 }
 0x285   : > { %v853_v59 = vsel %vm804_vm3, %v4136_v56, 0.0  ;;  %v4138_v60 = vpop.eup %4137 }
 0x286   : > { %4147 = vpow2.f32 %v849_v57  ;;  %v851_v61 = vmul.f32 1.442695, %v836_v58  ;;  %854 = vadd.xlane.f32.xlu0 %v853_v59  ;;  %v859_v63 = vsel %vm804_vm3, %v4138_v60, 0.0  ;;  %v897_v32 = vpack.c.bf16 %v708_v27, %v705_v23 }
 0x288   : > { %v4140_v62 = vpop.eup %4139  ;;  %4149 = vpow2.f32 %v851_v61  ;;  %3935 = vmatprep.subr.bf16.mxu1 %v897_v32  ;;  %v4004_v61 = vld [vmem:[%s4316_s18] sm:$0xff]  }
 0x289   : > { %v856_v0 = vsel %vm804_vm3, %v4140_v62, 0.0  ;;  %v4142_v1 = vpop.eup %4141  ;;  %3936 = vmatpush3.bf16.msra.mxu1 %v897_v32  ;;  %3946 = vmatpush3.bf16.msra.mxu0 %v4004_v61  ;;  %v1109_v61 = vld [vmem:[%s4321_s12 + $0x88] sm:$0xff] }
 0x28a   : > { %860 = vadd.xlane.f32.xlu0 %v859_v63  ;;  %857 = vadd.xlane.f32.xlu1 %v856_v0  ;;  %v862_v3 = vsel %vm804_vm3, %v4142_v1, 0.0  ;;  %v4006_v63 = vld [vmem:[%s4316_s18 + $0x10] sm:$0xff]  }
 0x28b   : > { %3947 = vmatprep.subr.bf16.mxu0 %v4219_v50 }
 0x28c   : > { %v4144_v2 = vpop.eup %4143 }
 0x28d   : > { %v865_v5 = vsel %vm804_vm3, %v4144_v2, 0.0 }
 0x28e   : > { %v4146_v6 = vpop.eup %4145  ;;  %863 = vadd.xlane.f32.xlu1 %v862_v3  ;;  %866 = vadd.xlane.f32.xlu0 %v865_v5 }
 0x28f   : > { %v868_v8 = vsel %vm804_vm3, %v4146_v6, 0.0 }
 0x290   : > { %v4148_v7 = vpop.eup %4147 }
 0x291   : > { %v871_v9 = vsel %vm804_vm3, %v4148_v7, 0.0 }
 0x292   : > { %v4150_v10 = vpop.eup %4149  ;;  %869 = vadd.xlane.f32.xlu1 %v868_v8  ;;  %872 = vadd.xlane.f32.xlu0 %v871_v9 }
 0x293   : > { %v874_v11 = vsel %vm804_vm3, %v4150_v10, 0.0 }
 0x296   : > { %875 = vadd.xlane.f32.xlu1 %v874_v11 }
 0x313   : > { %v855_v33 = vpop.xlane.xlu0 %854 }
 0x314   : > { %4151 = vrcp.f32 %v855_v33 }
 0x317   : > { %v858_v34 = vpop.xlane.xlu1 %857  ;;  %v861_v35 = vpop.xlane.xlu0 %860 }
 0x318   : > { %4153 = vrcp.f32 %v858_v34 }
 0x319   : > { %4155 = vrcp.f32 %v861_v35 }
 0x31b   : > { %v864_v36 = vpop.xlane.xlu1 %863  ;;  %v867_v37 = vpop.xlane.xlu0 %866 }
 0x31c   : > { %4157 = vrcp.f32 %v864_v36 }
 0x31d   : > { %4159 = vrcp.f32 %v867_v37  ;;  %v4175_v37 = vld [vmem:[#allocation2] sm:$0xff] }
 0x31e   : > { %v4152_v39 = vpop.eup %4151 }
 0x31f   : > { %v870_v38 = vpop.xlane.xlu1 %869  ;;  %v873_v15 = vpop.xlane.xlu0 %872  ;;  %v885_v42 = vmul.f32 %v4152_v39, %v4136_v56 }
 0x320   : > { %4161 = vrcp.f32 %v870_v38 }
 0x321   : > { %4163 = vrcp.f32 %v873_v15  ;;  %v4176_v15 = vld [vmem:[#allocation2 + $0x8] sm:$0xff] }
 0x322   : > { %v4154_v40 = vpop.eup %4153 }
 0x323   : > { %v876_v41 = vpop.xlane.xlu1 %875  ;;  %v886_v43 = vmul.f32 %v4154_v40, %v4140_v62  ;;  %v4156_v44 = vpop.eup %4155  ;;  %v4005_v62 = vld [vmem:[%s4316_s18 + $0x8] sm:$0xff]  }
 0x324   : > { %4165 = vrcp.f32 %v876_v41  ;;  %v887_v47 = vmul.f32 %v4156_v44, %v4138_v60  ;;  %3948 = vmatpush3.bf16.msra.mxu0 %v4005_v62 }
 0x325   : > { %v893_v45 = vpack.c.bf16 %v886_v43, %v885_v42  ;;  %3949 = vmatprep.subr.bf16.mxu0 %v4219_v50 }
 0x326   : > { %v4158_v46 = vpop.eup %4157 }
 0x327   : > { %v888_v48 = vmul.f32 %v4158_v46, %v4142_v1  ;;  %3937 = vmatprep.mubr.msk.bf16.mxu1 %vm804_vm3, %v893_v45  ;;  %v4160_v49 = vpop.eup %4159 }
 0x328   : > { %v889_v53 = vmul.f32 %v4160_v49, %v4144_v2  ;;  %3950 = vmatpush3.bf16.msra.mxu0 %v4006_v63  ;;  %v1111_v63 = vld [vmem:[%s4321_s12 + $0xc8] sm:$0xff] }
 0x329   : > { %v894_v51 = vpack.c.bf16 %v888_v48, %v887_v47 }
 0x32a   : > { %v4162_v52 = vpop.eup %4161 }
 0x32b   : > { %3938 = vmatmul.mubr.msk.bf16.vlgmr.msra.gmra.mrb[4].mxu1 %vm804_vm3, %v894_v51  ;;  %v890_v54 = vmul.f32 %v4162_v52, %v4146_v6  ;;  %v4164_v55 = vpop.eup %4163  ;;  %v1104_v51 = vld [vmem:[%s4321_s12] sm:$0xff] }
 0x32c   : > { %v891_v58 = vmul.f32 %v4164_v55, %v4148_v7  ;;  %v1106_v52 = vld [vmem:[%s4321_s12 + $0x40] sm:$0xff]  ;;  %v1107_v55 = vld [vmem:[%s4321_s12 + $0x48] sm:$0xff] }
 0x32d   : > { %v895_v56 = vpack.c.bf16 %v890_v54, %v889_v53  ;;  %v1105_v53 = vld [vmem:[%s4321_s12 + $0x8] sm:$0xff]  ;;  %v3520_v54 = vcombine.high %v1104_v51, %v1106_v52 }
 0x32e   : > { %v4166_v57 = vpop.eup %4165 }
 0x32f   : > { %3941 = vmatprep.mubr.msk.bf16.mxu1 %vm804_vm3, %v895_v56  ;;  %v892_v59 = vmul.f32 %v4166_v57, %v4150_v10  ;;  %v3519_v56 = vcombine.low %v1104_v51, %v1106_v52  ;;  %v3521_v57 = vcombine.low %v1105_v53, %v1107_v55  ;;  %1201 = vmatprep.subr.bf16.mxu1 %v3520_v54 }
 0x331   : > { %v896_v60 = vpack.c.bf16 %v892_v59, %v891_v58  ;;  %v3522_v58 = vcombine.high %v1105_v53, %v1107_v55  ;;  %1202 = vmatpush1.bf16.msra.mxu1 %v3519_v56  ;;  %v1108_v59 = vld [vmem:[%s4321_s12 + $0x80] sm:$0xff] }
 0x333   : > { %3942 = vmatmul.mubr.msk.bf16.gmra.mrb[8].mxu1 %vm804_vm3, %v896_v60  ;;  %1244 = vmatprep.subr.bf16.mxu0 %v3522_v58  ;;  %v1110_v60 = vld [vmem:[%s4321_s12 + $0xc0] sm:$0xff] }
 0x334   : > { %1233 = vmatprep.mubr.bf16.mxu1 %v4218_v4  ;;  %v3524_v62 = vcombine.high %v1108_v59, %v1110_v60  ;;  %v4008_v58 = vld [vmem:[%s4306_s29 + $0x1c0] sm:$0xff]  }
 0x336   : > { %1203 = vmatprep.subr.bf16.mxu1 %v3524_v62  ;;  %v4012_v62 = vld [vmem:[%s4306_s29 + $0x1c8] sm:$0xff]  }
 0x3fe   : > { %v3939_v0 = vpop.f32.mrb[4].mxu1 }
 0x3ff   : > { %v977_v1 = vmul.f32 %v3939_v0, %v4376_v21  ;;  %v944_v2 = vpop.f32.mrb[5].mxu1  ;;  %v3523_v0 = vcombine.low %v1108_v59, %v1110_v60  ;;  %v4009_v59 = vld [vmem:[%s4306_s29 + $0x100] sm:$0xff]  }
 0x400   : > { %v975_v3 = vmul.f32 %v944_v2, %v4371_v20  ;;  %v3940_v5 = vpop.f32.mrb[6].mxu1  ;;  %v3526_v2 = vcombine.high %v1109_v61, %v1111_v63  ;;  %v4010_v60 = vld [vmem:[%s4306_s29 + $0x180] sm:$0xff]  }
 0x401   : > { %v978_v6 = vmul.f32 %v3940_v5, %v4396_v28  ;;  %v947_v7 = vpop.f32.mrb[7].mxu1  ;;  %1204 = vmatpush1.bf16.msra.mxu1 %v3523_v0  ;;  %v1114_v5 = vld [vmem:[%s4321_s12 + $0x140] sm:$0xff]  ;;  %v4014_v0 = vld [vmem:[%s4306_s29 + $0x188] sm:$0xff]  }
 0x402   : > { %v983_v8 = vadd.f32 %v977_v1, %v975_v3  ;;  %v976_v9 = vmul.f32 %v947_v7, %v4391_v26  ;;  %v3512_v26 = vld [vmem:[%s4331_s13] ss:$0 sm:$0xff]  ;;  %v3525_v1 = vcombine.low %v1109_v61, %v1111_v63  ;;  %v4011_v61 = vld [vmem:[%s4306_s29 + $0x148] sm:$0xff]  }
 0x403   : > { %v1112_v3 = vld [vmem:[%s4321_s12 + $0x100] sm:$0xff]  ;;  %v4013_v63 = vld [vmem:[%s4306_s29 + $0x108] sm:$0xff]  }
 0x404   : > { %v984_v10 = vadd.f32 %v978_v6, %v976_v9  ;;  %v1113_v6 = vld [vmem:[%s4321_s12 + $0x108] sm:$0xff]  ;;  %v3528_v7 = vcombine.high %v1112_v3, %v1114_v5  ;;  %v3527_v9 = vcombine.low %v1112_v3, %v1114_v5  ;;  %v4017_v3 = vld [vmem:[%s4306_s29 + $0x110] sm:$0xff]  }
 0x405   : > { %v4018_v5 = vld [vmem:[%s4306_s29 + $0x190] sm:$0xff]  }
 0x406   : > { %v3943_v11 = vpop.f32.mrb[8].mxu1  ;;  %1205 = vmatprep.subr.bf16.mxu1 %v3528_v7  ;;  %v4020_v7 = vld [vmem:[%s4306_s29 + $0x1d8] sm:$0xff]  }
 0x407   : > { %v960_v17 = vpop.f32.mrb[9].mxu1  ;;  %v981_v21 = vmul.f32 %v3943_v11, %v4386_v25  ;;  %1206 = vmatpush1.bf16.msra.mxu1 %v3527_v9  ;;  %v4022_v9 = vld [vmem:[%s4306_s29 + $0x198] sm:$0xff]  }
 0x408   : > { %v979_v50 = vmul.f32 %v960_v17, %v4381_v24  ;;  %v3944_v18 = vpop.f32.mrb[10].mxu1  ;;  %v1363_v17 = vld [vmem:[%s4321_s12 + $0x10] sm:$0xff] }
 0x409   : > { %v963_v19 = vpop.f32.mrb[11].mxu1  ;;  %v982_v28 = vmul.f32 %v3944_v18, %v4406_v30  ;;  %v1364_v18 = vld [vmem:[%s4321_s12 + $0x18] sm:$0xff] }
 0x40a   : > { %v985_v22 = vadd.f32 %v983_v8, %v979_v50  ;;  %v980_v20 = vmul.f32 %v963_v19, %v4401_v29  ;;  %v1115_v8 = vld [vmem:[%s4321_s12 + $0x148] sm:$0xff]  ;;  %v1365_v50 = vld [vmem:[%s4321_s12 + $0x50] sm:$0xff] }
 0x40b   : > { %v3530_v11 = vcombine.high %v1113_v6, %v1115_v8  ;;  %v3533_v19 = vcombine.low %v1363_v17, %v1365_v50 }
 0x40c   : > { %v987_v23 = vadd.f32 %v985_v22, %v981_v21  ;;  %v986_v27 = vadd.f32 %v984_v10, %v980_v20  ;;  %v3529_v10 = vcombine.low %v1113_v6, %v1115_v8  ;;  %v3534_v21 = vcombine.high %v1363_v17, %v1365_v50  ;;  %v1366_v22 = vld [vmem:[%s4321_s12 + $0x58] sm:$0xff]  ;;  %v4025_v17 = vld [vmem:[%s4306_s29 + $0x120] sm:$0xff]  }
 0x40d   : > { %v3535_v20 = vcombine.low %v1364_v18, %v1366_v22  ;;  %v4019_v6 = vld [vmem:[%s4306_s29 + $0x158] sm:$0xff]   ;;  %v4026_v50 = vld [vmem:[%s4306_s29 + $0x1a0] sm:$0xff]  }
 0x40e   : > { %v988_v31 = vadd.f32 %v986_v27, %v982_v28  ;;  %1457 = vmatprep.subr.bf16.mxu1 %v3534_v21  ;;  %v4021_v8 = vld [vmem:[%s4306_s29 + $0x118] sm:$0xff]   ;;  %v4029_v21 = vld [vmem:[%s4306_s29 + $0x128] sm:$0xff]  }
 0x410   : > { %v989_v32 = vpack.c.bf16 %v988_v31, %v987_v23  ;;  %v3536_v23 = vcombine.high %v1364_v18, %v1366_v22  ;;  %v4027_v18 = vld [vmem:[%s4306_s29 + $0x168] sm:$0xff]  }
 0x411   : > { %v4030_v22 = vld [vmem:[%s4306_s29 + $0x1a8] sm:$0xff]  }
 0x412   : > { %3952 = vmatmul.mubr.msk.bf16.vlgmr.msra.gmra.mrb[12].mxu0 %vm623_vm1, %v989_v32 }
 0x413   : > { %1276 = vmatprep.mubr.bf16.mxu0 %v4218_v4  ;;  %1245 = vmatpush1.bf16.msra.mxu0 %v3521_v57  ;;  %v4007_v57 = vld [vmem:[%s4306_s29 + $0x140] sm:$0xff]  }
 0x414   : > { %1246 = vmatprep.subr.bf16.mxu0 %v3526_v2  ;;  %v4016_v2 = vld [vmem:[%s4306_s29 + $0x1d0] sm:$0xff]  }
 0x417   : > { %1247 = vmatpush1.bf16.msra.mxu0 %v3525_v1  ;;  %v4015_v1 = vld [vmem:[%s4306_s29 + $0x150] sm:$0xff]  }
 0x418   : > { %1248 = vmatprep.subr.bf16.mxu0 %v3530_v11  ;;  %v4024_v11 = vld [vmem:[%s4306_s29 + $0x1e0] sm:$0xff]  }
 0x41b   : > { %1249 = vmatpush1.bf16.msra.mxu0 %v3529_v10  ;;  %v4023_v10 = vld [vmem:[%s4306_s29 + $0x160] sm:$0xff]  }
 0x41c   : > { %1500 = vmatprep.subr.bf16.mxu0 %v3536_v23  ;;  %v4032_v23 = vld [vmem:[%s4306_s29 + $0x1f0] sm:$0xff]  }
 0x4e5   : > { %v1055_v33 = vpop.f32.mrb[12].mxu0 }
 0x4e6   : > { %v1056_v24 = vadd.f32 %v3512_v26, %v1055_v33  ;;  %v3953_v34 = vpop.f32.mrb[13].mxu0 }
 0x4e7   : > { %v1058_v35 = vpop.f32.mrb[14].mxu0  ;;  %v3517_v34 = vld [vmem:[%s4331_s13 + $0x2] ss:$0 sm:$0xff] }
 0x4e8   : > { %v1059_v36 = vadd.f32 %v3512_v26, %v1058_v35  ;;  %v3954_v25 = vpop.f32.mrb[15].mxu0  ;;  %v1062_v38 = vadd.f32 %v4175_v37, %v1056_v24 }
 0x4ea   : > { %v1064_v29 = vsel %vm623_vm1, %v1062_v38, 0.0  ;;  %v1063_v30 = vadd.f32 %v4176_v15, %v1059_v36  ;;  %v1367_v15 = vld [vmem:[%s4321_s12 + $0x90] sm:$0xff] }
 0x4eb   : > { %1065 = vadd.xlane.f32.xlu0 %v1064_v29 }
 0x4ec   : > { %v1067_v39 = vsel %vm623_vm1, %v1063_v30, 0.0 }
 0x4ed   : > { %1068 = vadd.xlane.f32.xlu1 %v1067_v39  ;;  %v1368_v39 = vld [vmem:[%s4321_s12 + $0x98] sm:$0xff] }
 0x578   : > { %v1066_v40 = vpop.xlane.xlu0 %1065 }
 0x579   : > { %v1071_v41 = vmul.f32 0.020833334, %v1066_v40  ;;  %v1370_v40 = vld [vmem:[%s4321_s12 + $0xd8] sm:$0xff] }
 0x57a   : > { %v1069_v42 = vpop.xlane.xlu1 %1068  ;;  %v3539_v52 = vcombine.low %v1368_v39, %v1370_v40 }
 0x57b   : > { %v4500_v43 = vsub.f32 %v1062_v38, %v1071_v41  ;;  %v1072_v44 = vmul.f32 0.020833334, %v1069_v42  ;;  %v3518_v38 = vld [vmem:[%s4331_s13 + $0x3] ss:$0 sm:$0xff] }
 0x57d   : > { %v4502_v45 = vsub.f32 %v1063_v30, %v1072_v44  ;;  %v1075_v46 = vmul.f32 %v4500_v43, %v4500_v43  ;;  %v1369_v30 = vld [vmem:[%s4321_s12 + $0xd0] sm:$0xff] }
 0x57e   : > { %v3538_v44 = vcombine.high %v1367_v15, %v1369_v30  ;;  %v3537_v51 = vcombine.low %v1367_v15, %v1369_v30 }
 0x57f   : > { %v1077_v47 = vsel %vm623_vm1, %v1075_v46, 0.0  ;;  %v1076_v48 = vmul.f32 %v4502_v45, %v4502_v45  ;;  %v3540_v46 = vcombine.high %v1368_v39, %v1370_v40 }
 0x580   : > { %1078 = vadd.xlane.f32.xlu0 %v1077_v47  ;;  %v1371_v47 = vld [vmem:[%s4321_s12 + $0x110] sm:$0xff] }
 0x581   : > { %v1080_v49 = vsel %vm623_vm1, %v1076_v48, 0.0  ;;  %v1373_v48 = vld [vmem:[%s4321_s12 + $0x150] sm:$0xff] }
 0x582   : > { %1081 = vadd.xlane.f32.xlu1 %v1080_v49  ;;  %v1372_v49 = vld [vmem:[%s4321_s12 + $0x118] sm:$0xff]  ;;  %v3542_v53 = vcombine.high %v1371_v47, %v1373_v48  ;;  %v3541_v55 = vcombine.low %v1371_v47, %v1373_v48 }
 0x60d   : > { %v1079_v28 = vpop.xlane.xlu0 %1078 }
 0x60e   : > { %v1083_v27 = vmul.f32 0.020833334, %v1079_v28  ;;  %v4033_v28 = vld [vmem:[%s4306_s29 + $0x130] sm:$0xff]  }
 0x60f   : > { %v1082_v31 = vpop.xlane.xlu1 %1081 }
 0x610   : > { %v1085_v32 = vadd.f32 1e-05, %v1083_v27  ;;  %v1084_v26 = vmul.f32 0.020833334, %v1082_v31  ;;  %v4034_v27 = vld [vmem:[%s4306_s29 + $0x1b0] sm:$0xff]   ;;  %v4035_v31 = vld [vmem:[%s4306_s29 + $0x178] sm:$0xff]  }
 0x612   : > { %4167 = vrsqrt.f32 %v1085_v32  ;;  %v1086_v33 = vadd.f32 1e-05, %v1084_v26  ;;  %v4036_v32 = vld [vmem:[%s4306_s29 + $0x1f8] sm:$0xff]  }
 0x613   : > { %v4037_v26 = vld [vmem:[%s4306_s29 + $0x138] sm:$0xff]  }
 0x614   : > { %4169 = vrsqrt.f32 %v1086_v33  ;;  %v4038_v33 = vld [vmem:[%s4306_s29 + $0x1b8] sm:$0xff]  }
 0x61c   : > { %v4168_v24 = vpop.eup %4167 }
 0x61d   : > { %v1089_v35 = vmul.f32 %v4168_v24, %v4500_v43  ;;  %v4039_v24 = vld [vmem:[%s4306_s29 + $0x40] sm:$0xff]  }
 0x61e   : > { %v4170_v36 = vpop.eup %4169 }
 0x61f   : > { %v1095_v25 = vmul.f32 %v3517_v34, %v1089_v35  ;;  %v1090_v37 = vmul.f32 %v4170_v36, %v4502_v45  ;;  %v1374_v45 = vld [vmem:[%s4321_s12 + $0x158] sm:$0xff]  ;;  %v1116_v35 = vld [vmem:[%s4336_s3] sm:$0xf]  ;;  %v4592_v36 = vsub.s32 3, %v4353_v13 }
 0x620   : > { %v3544_v54 = vcombine.high %v1372_v49, %v1374_v45  ;;  %v3543_v56 = vcombine.low %v1372_v49, %v1374_v45 }
 0x621   : > { %v1096_v29 = vmul.f32 %v3517_v34, %v1090_v37  ;;  %v4534_v41 = vadd.f32 %v3518_v38, %v1095_v25  ;;  %v4040_v34 = vld [vmem:[%s4306_s29 + $0xc0] sm:$0xff]   ;;  %v1121_v25 = vrot.slane %v1116_v35, %v4356_v14  ;;  %v1129_v37 = vrot.slane %v1116_v35, %v4473_v12 }
 0x623   : > { %v4536_v42 = vadd.f32 %v3518_v38, %v1096_v29  ;;  %v1125_v38 = vrot.slane %v1116_v35, %v4362_v16  ;;  %v1133_v29 = vrot.slane %v1116_v35, %v4592_v36 }
 0x625   : > { %v4540_v43 = vpack.c.bf16 %v4536_v42, %v4534_v41 }
 0x627   : > { %3531 = vmatmul.mubr.msk.bf16.vlgmr.msra.gmra.mrb[12].mxu1 %vm623_vm1, %v4540_v43  ;;  %3532 = vmatmul.mubr.msk.bf16.vlgmr.msra.gmra.mrb[16].mxu0 %vm623_vm1, %v4540_v43 }
 0x628   : > { %1458 = vmatpush1.bf16.msra.mxu1 %v3533_v19  ;;  %1501 = vmatpush1.bf16.msra.mxu0 %v3535_v20  ;;  %v4028_v19 = vld [vmem:[%s4306_s29 + $0x1e8] sm:$0xff]   ;;  %v4031_v20 = vld [vmem:[%s4306_s29 + $0x170] sm:$0xff]  }
 0x629   : > { %1459 = vmatprep.subr.bf16.mxu1 %v3538_v44  ;;  %1502 = vmatprep.subr.bf16.mxu0 %v3540_v46 }
 0x62a   : > { %1489 = vmatprep.mubr.bf16.mxu1 %v4218_v4  ;;  %1532 = vmatprep.mubr.bf16.mxu0 %v4218_v4 }
 0x62c   : > { %1460 = vmatpush1.bf16.msra.mxu1 %v3537_v51  ;;  %1503 = vmatpush1.bf16.msra.mxu0 %v3539_v52 }
 0x62d   : > { %1461 = vmatprep.subr.bf16.mxu1 %v3542_v53  ;;  %1504 = vmatprep.subr.bf16.mxu0 %v3544_v54 }
 0x630   : > { %1462 = vmatpush1.bf16.msra.mxu1 %v3541_v55  ;;  %1505 = vmatpush1.bf16.msra.mxu0 %v3543_v56 }
 0x631   : > { %3735 = vmatprep.subr.bf16.mxu1 %v4007_v57  ;;  %3757 = vmatprep.subr.bf16.mxu0 %v4008_v58 }
 0x633   : > { %3545 = vmatmul.mubr.msk.bf16.vlgmr.msra.gmra.mrb[16].mxu1 %vm623_vm1, %v4540_v43  ;;  %3546 = vmatmul.mubr.msk.bf16.vlgmr.msra.gmra.mrb[20].mxu0 %vm623_vm1, %v4540_v43 }
 0x634   : > { %3736 = vmatpush3.bf16.msra.mxu1 %v4009_v59  ;;  %3758 = vmatpush3.bf16.msra.mxu0 %v4010_v60 }
 0x635   : > { %3737 = vmatprep.subr.bf16.mxu1 %v4011_v61  ;;  %3759 = vmatprep.subr.bf16.mxu0 %v4012_v62 }
 0x638   : > { %3738 = vmatpush3.bf16.msra.mxu1 %v4013_v63  ;;  %3760 = vmatpush3.bf16.msra.mxu0 %v4014_v0  ;;  %v1375_v0 = vld [vmem:[%s4336_s3 + $0x4] sm:$0xf] }
 0x639   : > { %3739 = vmatprep.subr.bf16.mxu1 %v4015_v1  ;;  %3761 = vmatprep.subr.bf16.mxu0 %v4016_v2 }
 0x63c   : > { %3740 = vmatpush3.bf16.msra.mxu1 %v4017_v3  ;;  %3762 = vmatpush3.bf16.msra.mxu0 %v4018_v5 }
 0x63d   : > { %3741 = vmatprep.subr.bf16.mxu1 %v4019_v6  ;;  %3763 = vmatprep.subr.bf16.mxu0 %v4020_v7  ;;  %v1380_v6 = vrot.slane %v1375_v0, %v4356_v14  ;;  %v1388_v7 = vrot.slane %v1375_v0, %v4473_v12 }
 0x640   : > { %3742 = vmatpush3.bf16.msra.mxu1 %v4021_v8  ;;  %3764 = vmatpush3.bf16.msra.mxu0 %v4022_v9  ;;  %v1384_v8 = vrot.slane %v1375_v0, %v4362_v16  ;;  %v1392_v9 = vrot.slane %v1375_v0, %v4592_v36  ;;  %v4060_v0 = vld [vmem:[%s4306_s29 + $0xe8] sm:$0xff]  }
 0x641   : > { %3743 = vmatprep.subr.bf16.mxu1 %v4023_v10  ;;  %3765 = vmatprep.subr.bf16.mxu0 %v4024_v11 }
 0x644   : > { %3744 = vmatpush3.bf16.msra.mxu1 %v4025_v17  ;;  %3766 = vmatpush3.bf16.msra.mxu0 %v4026_v50 }
 0x645   : > { %3745 = vmatprep.subr.bf16.mxu1 %v4027_v18  ;;  %3767 = vmatprep.subr.bf16.mxu0 %v4028_v19 }
 0x648   : > { %3746 = vmatpush3.bf16.msra.mxu1 %v4029_v21  ;;  %3768 = vmatpush3.bf16.msra.mxu0 %v4030_v22 }
 0x649   : > { %3747 = vmatprep.subr.bf16.mxu1 %v4031_v20  ;;  %3769 = vmatprep.subr.bf16.mxu0 %v4032_v23 }
 0x64c   : > { %3748 = vmatpush3.bf16.msra.mxu1 %v4033_v28  ;;  %3770 = vmatpush3.bf16.msra.mxu0 %v4034_v27 }
 0x64d   : > { %3749 = vmatprep.subr.bf16.mxu1 %v4035_v31  ;;  %3771 = vmatprep.subr.bf16.mxu0 %v4036_v32 }
 0x650   : > { %3750 = vmatpush3.bf16.msra.mxu1 %v4037_v26  ;;  %3772 = vmatpush3.bf16.msra.mxu0 %v4038_v33 }
 0x651   : > { %3779 = vmatprep.subr.bf16.mxu1 %v4039_v24  ;;  %3801 = vmatprep.subr.bf16.mxu0 %v4040_v34 }
 0x6fa   : > { %v1235_v15 = vpop.f32.mrb[12].mxu1  ;;  %v1278_v30 = vpop.f32.mrb[16].mxu0 }
 0x6fb   : > { %v1236_v39 = vadd.f32 %v1235_v15, %v1121_v25  ;;  %v1279_v40 = vadd.f32 %v1278_v30, %v1129_v37  ;;  %v1237_v44 = vpop.f32.mrb[13].mxu1  ;;  %v1280_v46 = vpop.f32.mrb[17].mxu0 }
 0x6fc   : > { %v1238_v47 = vadd.f32 %v1237_v44, %v1125_v38  ;;  %v1281_v48 = vadd.f32 %v1280_v46, %v1133_v29  ;;  %v1239_v49 = vpop.f32.mrb[14].mxu1  ;;  %v1282_v13 = vpop.f32.mrb[18].mxu0  ;;  %v4041_v46 = vld [vmem:[%s4306_s29] sm:$0xff]  }
 0x6fd   : > { %v1240_v45 = vadd.f32 %v1239_v49, %v1121_v25  ;;  %v1283_v51 = vadd.f32 %v1282_v13, %v1129_v37  ;;  %v1241_v52 = vpop.f32.mrb[15].mxu1  ;;  %v1284_v53 = vpop.f32.mrb[19].mxu0  ;;  %v1287_v56 = vmax.f32 %v1236_v39, 0.0  ;;  %v1289_v57 = vmax.f32 %v1279_v40, 0.0  ;;  %v4044_v49 = vld [vmem:[%s4306_s29 + $0xc8] sm:$0xff]  }
 0x6fe   : > { %v1242_v54 = vadd.f32 %v1241_v52, %v1125_v38  ;;  %v1285_v55 = vadd.f32 %v1284_v53, %v1133_v29  ;;  %v1288_v60 = vmax.f32 %v1238_v47, 0.0  ;;  %v1290_v61 = vmax.f32 %v1281_v48, 0.0  ;;  %v4042_v47 = vld [vmem:[%s4306_s29 + $0x80] sm:$0xff]   ;;  %v4043_v48 = vld [vmem:[%s4306_s29 + $0x48] sm:$0xff]   ;;  %v4048_v52 = vld [vmem:[%s4306_s29 + $0xd0] sm:$0xff]  }
 0x6ff   : > { %v1291_v58 = vmax.f32 %v1240_v45, 0.0  ;;  %v1293_v59 = vmax.f32 %v1283_v51, 0.0  ;;  %v4045_v13 = vld [vmem:[%s4306_s29 + $0x8] sm:$0xff]   ;;  %v4047_v51 = vld [vmem:[%s4306_s29 + $0x50] sm:$0xff]  }
 0x700   : > { %v1292_v62 = vmax.f32 %v1242_v54, 0.0  ;;  %v1294_v63 = vmax.f32 %v1285_v55, 0.0  ;;  %v4046_v45 = vld [vmem:[%s4306_s29 + $0x88] sm:$0xff]   ;;  %v4049_v53 = vld [vmem:[%s4306_s29 + $0x10] sm:$0xff]   ;;  %v4051_v55 = vld [vmem:[%s4306_s29 + $0x58] sm:$0xff]  }
 0x701   : > { %v4599_v1 = vpack.c.bf16 %v1291_v58, %v1287_v56  ;;  %v4601_v2 = vpack.c.bf16 %v1293_v59, %v1289_v57  ;;  %v4050_v54 = vld [vmem:[%s4306_s29 + $0x90] sm:$0xff]   ;;  %v4052_v56 = vld [vmem:[%s4306_s29 + $0xd8] sm:$0xff]   ;;  %v4055_v59 = vld [vmem:[%s4306_s29 + $0x60] sm:$0xff]  }
 0x702   : > { %v1296_v3 = vpack.c.bf16 %v1292_v62, %v1288_v60  ;;  %v1298_v5 = vpack.c.bf16 %v1294_v63, %v1290_v61  ;;  %v4053_v57 = vld [vmem:[%s4306_s29 + $0x18] sm:$0xff]   ;;  %v4056_v60 = vld [vmem:[%s4306_s29 + $0xe0] sm:$0xff]   ;;  %v4059_v63 = vld [vmem:[%s4306_s29 + $0x68] sm:$0xff]  }
 0x703   : > { %v4054_v58 = vld [vmem:[%s4306_s29 + $0x98] sm:$0xff]   ;;  %v4057_v61 = vld [vmem:[%s4306_s29 + $0x20] sm:$0xff]  }
 0x704   : > { %v4058_v62 = vld [vmem:[%s4306_s29 + $0xa0] sm:$0xff]  }
 0x706   : > { %v1491_v10 = vpop.f32.mrb[16].mxu1  ;;  %v1534_v11 = vpop.f32.mrb[20].mxu0 }
 0x707   : > { %v1492_v17 = vadd.f32 %v1491_v10, %v1380_v6  ;;  %v1535_v50 = vadd.f32 %v1534_v11, %v1388_v7  ;;  %v1493_v18 = vpop.f32.mrb[17].mxu1  ;;  %v1536_v19 = vpop.f32.mrb[21].mxu0  ;;  %v4067_v10 = vld [vmem:[%s4306_s29 + $0x78] sm:$0xff]  }
 0x708   : > { %v1494_v21 = vadd.f32 %v1493_v18, %v1384_v8  ;;  %v1537_v22 = vadd.f32 %v1536_v19, %v1392_v9  ;;  %v1495_v20 = vpop.f32.mrb[18].mxu1  ;;  %v1538_v23 = vpop.f32.mrb[22].mxu0  ;;  %v4068_v11 = vld [vmem:[%s4306_s29 + $0xf8] sm:$0xff]   ;;  %v2168_v18 = vld [vmem:[%s4321_s12 + $0x28] sm:$0xff] }
 0x709   : > { %v1496_v28 = vadd.f32 %v1495_v20, %v1380_v6  ;;  %v1539_v27 = vadd.f32 %v1538_v23, %v1388_v7  ;;  %v1497_v31 = vpop.f32.mrb[19].mxu1  ;;  %v1540_v32 = vpop.f32.mrb[23].mxu0  ;;  %v1543_v24 = vmax.f32 %v1492_v17, 0.0  ;;  %v1545_v34 = vmax.f32 %v1535_v50, 0.0  ;;  %v4063_v6 = vld [vmem:[%s4306_s29 + $0x70] sm:$0xff]   ;;  %v2167_v17 = vld [vmem:[%s4321_s12 + $0x20] sm:$0xff] }
 0x70a   : > { %v1498_v26 = vadd.f32 %v1497_v31, %v1384_v8  ;;  %v1541_v33 = vadd.f32 %v1540_v32, %v1392_v9  ;;  %v1544_v37 = vmax.f32 %v1494_v21, 0.0  ;;  %v1546_v38 = vmax.f32 %v1537_v22, 0.0  ;;  %v4064_v7 = vld [vmem:[%s4306_s29 + $0xf0] sm:$0xff]   ;;  %v2169_v50 = vld [vmem:[%s4321_s12 + $0x60] sm:$0xff]  ;;  %v2170_v19 = vld [vmem:[%s4321_s12 + $0x68] sm:$0xff] }
 0x70b   : > { %v1547_v35 = vmax.f32 %v1496_v28, 0.0  ;;  %v1549_v25 = vmax.f32 %v1539_v27, 0.0  ;;  %v4065_v8 = vld [vmem:[%s4306_s29 + $0x30] sm:$0xff]   ;;  %v4069_v21 = vld [vmem:[%s4306_s29 + $0x38] sm:$0xff]   ;;  %v3612_v20 = vcombine.high %v2167_v17, %v2169_v50  ;;  %v3614_v23 = vcombine.high %v2168_v18, %v2170_v19  ;;  %v2171_v28 = vld [vmem:[%s4321_s12 + $0xa0] sm:$0xff] }
 0x70c   : > { %v1548_v29 = vmax.f32 %v1498_v26, 0.0  ;;  %v1550_v15 = vmax.f32 %v1541_v33, 0.0  ;;  %v4066_v9 = vld [vmem:[%s4306_s29 + $0xb0] sm:$0xff]   ;;  %v4070_v22 = vld [vmem:[%s4306_s29 + $0xb8] sm:$0xff]   ;;  %v2173_v27 = vld [vmem:[%s4321_s12 + $0xe0] sm:$0xff]  ;;  %v3611_v26 = vcombine.low %v2167_v17, %v2169_v50  ;;  %v3613_v33 = vcombine.low %v2168_v18, %v2170_v19 }
 0x70d   : > { %v1551_v30 = vpack.c.bf16 %v1547_v35, %v1543_v24  ;;  %v1553_v39 = vpack.c.bf16 %v1549_v25, %v1545_v34  ;;  %v2172_v31 = vld [vmem:[%s4321_s12 + $0xa8] sm:$0xff]  ;;  %v3616_v24 = vcombine.high %v2171_v28, %v2173_v27  ;;  %v2175_v35 = vld [vmem:[%s4321_s12 + $0x120] sm:$0xff]  ;;  %v4101_v17 = vld [vmem:[%s4306_s29 + $0x238] sm:$0xff]  }
 0x70e   : > { %v1552_v40 = vpack.c.bf16 %v1548_v29, %v1544_v37  ;;  %v1554_v44 = vpack.c.bf16 %v1550_v15, %v1546_v38  ;;  %v2174_v32 = vld [vmem:[%s4321_s12 + $0xe8] sm:$0xff]  ;;  %v2177_v25 = vld [vmem:[%s4321_s12 + $0x160] sm:$0xff]  ;;  %v3615_v29 = vcombine.low %v2171_v28, %v2173_v27  ;;  %v4102_v50 = vld [vmem:[%s4306_s29 + $0x2b8] sm:$0xff]  }
 0x70f   : > { %v3618_v34 = vcombine.high %v2172_v31, %v2174_v32  ;;  %v2176_v37 = vld [vmem:[%s4321_s12 + $0x128] sm:$0xff]  ;;  %v3617_v15 = vcombine.low %v2172_v31, %v2174_v32  ;;  %v4690_v18 = vld [vmem:[%s4321_s12 + $0x30] sm:$0xff] }
 0x710   : > { %1843 = vmatprep.mubr.bf16.mxu1 %v1552_v40  ;;  %1884 = vmatprep.mubr.bf16.mxu0 %v1554_v44  ;;  %v2178_v38 = vld [vmem:[%s4321_s12 + $0x168] sm:$0xff]  ;;  %v4071_v40 = vld [vmem:[%s4306_s29 + $0x240] sm:$0xff]   ;;  %v4693_v19 = vld [vmem:[%s4321_s12 + $0x70] sm:$0xff] }
 0x711   : > { %1844 = vmatmul.mubr.bf16.vlgmr.msra.gmra.mrb[20].mxu1 %v1551_v30  ;;  %1885 = vmatmul.mubr.bf16.vlgmr.msra.gmra.mrb[24].mxu0 %v1553_v39  ;;  %v3620_v30 = vcombine.high %v2175_v35, %v2177_v25  ;;  %v3622_v39 = vcombine.high %v2176_v37, %v2178_v38  ;;  %v4072_v44 = vld [vmem:[%s4306_s29 + $0x2c0] sm:$0xff]  }
 0x712   : > { %3780 = vmatpush3.bf16.msra.mxu1 %v4041_v46  ;;  %3802 = vmatpush3.bf16.msra.mxu0 %v4042_v47  ;;  %v4073_v46 = vld [vmem:[%s4306_s29 + $0x200] sm:$0xff]  }
 0x713   : > { %2117 = vmatprep.mubr.bf16.mxu1 %v1296_v3  ;;  %2158 = vmatprep.mubr.bf16.mxu0 %v1298_v5  ;;  %v4061_v3 = vld [vmem:[%s4306_s29 + $0x28] sm:$0xff]   ;;  %v4074_v47 = vld [vmem:[%s4306_s29 + $0x280] sm:$0xff]  }
 0x714   : > { %3781 = vmatprep.subr.bf16.mxu1 %v4043_v48  ;;  %3803 = vmatprep.subr.bf16.mxu0 %v4044_v49  ;;  %v4062_v5 = vld [vmem:[%s4306_s29 + $0xa8] sm:$0xff]  }
 0x715   : > { %v4075_v48 = vld [vmem:[%s4306_s29 + $0x248] sm:$0xff]  }
 0x716   : > { %3782 = vmatpush3.bf16.msra.mxu1 %v4045_v13  ;;  %3804 = vmatpush3.bf16.msra.mxu0 %v4046_v45  ;;  %v4076_v49 = vld [vmem:[%s4306_s29 + $0x2c8] sm:$0xff]  }
 0x717   : > { %3783 = vmatprep.subr.bf16.mxu1 %v4047_v51  ;;  %3805 = vmatprep.subr.bf16.mxu0 %v4048_v52  ;;  %v4077_v13 = vld [vmem:[%s4306_s29 + $0x208] sm:$0xff]   ;;  %v4079_v51 = vld [vmem:[%s4306_s29 + $0x250] sm:$0xff]  }
 0x718   : > { %v4078_v45 = vld [vmem:[%s4306_s29 + $0x288] sm:$0xff]   ;;  %v4080_v52 = vld [vmem:[%s4306_s29 + $0x2d0] sm:$0xff]  }
 0x71a   : > { %3784 = vmatpush3.bf16.msra.mxu1 %v4049_v53  ;;  %3806 = vmatpush3.bf16.msra.mxu0 %v4050_v54  ;;  %v4081_v53 = vld [vmem:[%s4306_s29 + $0x210] sm:$0xff]  }
 0x71b   : > { %3785 = vmatprep.subr.bf16.mxu1 %v4051_v55  ;;  %3807 = vmatprep.subr.bf16.mxu0 %v4052_v56  ;;  %v4082_v54 = vld [vmem:[%s4306_s29 + $0x290] sm:$0xff]   ;;  %v4083_v55 = vld [vmem:[%s4306_s29 + $0x258] sm:$0xff]  }
 0x71c   : > { %v4084_v56 = vld [vmem:[%s4306_s29 + $0x2d8] sm:$0xff]  }
 0x71e   : > { %3786 = vmatpush3.bf16.msra.mxu1 %v4053_v57  ;;  %3808 = vmatpush3.bf16.msra.mxu0 %v4054_v58  ;;  %v4085_v57 = vld [vmem:[%s4306_s29 + $0x218] sm:$0xff]  }
 0x71f   : > { %3787 = vmatprep.subr.bf16.mxu1 %v4055_v59  ;;  %3809 = vmatprep.subr.bf16.mxu0 %v4056_v60  ;;  %v4086_v58 = vld [vmem:[%s4306_s29 + $0x298] sm:$0xff]   ;;  %v4087_v59 = vld [vmem:[%s4306_s29 + $0x260] sm:$0xff]  }
 0x720   : > { %v4088_v60 = vld [vmem:[%s4306_s29 + $0x2e0] sm:$0xff]  }
 0x722   : > { %3788 = vmatpush3.bf16.msra.mxu1 %v4057_v61  ;;  %3810 = vmatpush3.bf16.msra.mxu0 %v4058_v62  ;;  %v4089_v61 = vld [vmem:[%s4306_s29 + $0x220] sm:$0xff]  }
 0x723   : > { %3789 = vmatprep.subr.bf16.mxu1 %v4059_v63  ;;  %3811 = vmatprep.subr.bf16.mxu0 %v4060_v0  ;;  %v4090_v62 = vld [vmem:[%s4306_s29 + $0x2a0] sm:$0xff]   ;;  %v4091_v63 = vld [vmem:[%s4306_s29 + $0x268] sm:$0xff]  }
 0x724   : > { %v4092_v0 = vld [vmem:[%s4306_s29 + $0x2e8] sm:$0xff]  }
 0x726   : > { %3790 = vmatpush3.bf16.msra.mxu1 %v4061_v3  ;;  %3812 = vmatpush3.bf16.msra.mxu0 %v4062_v5  ;;  %v4093_v3 = vld [vmem:[%s4306_s29 + $0x228] sm:$0xff]  }
 0x727   : > { %3791 = vmatprep.subr.bf16.mxu1 %v4063_v6  ;;  %3813 = vmatprep.subr.bf16.mxu0 %v4064_v7  ;;  %v4094_v5 = vld [vmem:[%s4306_s29 + $0x2a8] sm:$0xff]   ;;  %v4095_v6 = vld [vmem:[%s4306_s29 + $0x270] sm:$0xff]  }
 0x728   : > { %v4096_v7 = vld [vmem:[%s4306_s29 + $0x2f0] sm:$0xff]  }
 0x72a   : > { %3792 = vmatpush3.bf16.msra.mxu1 %v4065_v8  ;;  %3814 = vmatpush3.bf16.msra.mxu0 %v4066_v9  ;;  %v4097_v8 = vld [vmem:[%s4306_s29 + $0x230] sm:$0xff]  }
 0x72b   : > { %3793 = vmatprep.subr.bf16.mxu1 %v4067_v10  ;;  %3815 = vmatprep.subr.bf16.mxu0 %v4068_v11  ;;  %v4098_v9 = vld [vmem:[%s4306_s29 + $0x2b0] sm:$0xff]   ;;  %v4099_v10 = vld [vmem:[%s4306_s29 + $0x278] sm:$0xff]  }
 0x72c   : > { %v4100_v11 = vld [vmem:[%s4306_s29 + $0x2f8] sm:$0xff]  }
 0x72e   : > { %3794 = vmatpush3.bf16.msra.mxu1 %v4069_v21  ;;  %3816 = vmatpush3.bf16.msra.mxu0 %v4070_v22  ;;  %v4696_v21 = vld [vmem:[%s4321_s12 + $0x38] sm:$0xff]  ;;  %v3658_v22 = vcombine.high %v4690_v18, %v4693_v19 }
 0x72f   : > { %2261 = vmatprep.subr.bf16.mxu1 %v3612_v20  ;;  %2304 = vmatprep.subr.bf16.mxu0 %v3614_v23  ;;  %v4701_v20 = vld [vmem:[%s4321_s12 + $0x78] sm:$0xff]  ;;  %v3657_v23 = vcombine.low %v4690_v18, %v4693_v19 }
 0x730   : > { %v3659_v28 = vcombine.low %v4696_v21, %v4701_v20  ;;  %v3660_v27 = vcombine.high %v4696_v21, %v4701_v20  ;;  %v4103_v21 = vld [vmem:[%s4306_s29 + $0x340] sm:$0xff]  }
 0x731   : > { %2118 = vmatmul.mubr.bf16.vlgmr.msra.gmra.mrb[24].mxu1 %v4599_v1  ;;  %2159 = vmatmul.mubr.bf16.vlgmr.msra.gmra.mrb[28].mxu0 %v4601_v2  ;;  %v3619_v1 = vcombine.low %v2175_v35, %v2177_v25  ;;  %v3621_v2 = vcombine.low %v2176_v37, %v2178_v38  ;;  %v4104_v20 = vld [vmem:[%s4306_s29 + $0x3c0] sm:$0xff]  }
 0x732   : > { %2262 = vmatpush1.bf16.msra.mxu1 %v3611_v26  ;;  %2305 = vmatpush1.bf16.msra.mxu0 %v3613_v33 }
 0x733   : > { %2263 = vmatprep.subr.bf16.mxu1 %v3616_v24  ;;  %2306 = vmatprep.subr.bf16.mxu0 %v3618_v34 }
 0x734   : > { %2293 = vmatprep.mubr.bf16.mxu1 %v4218_v4  ;;  %2336 = vmatprep.mubr.bf16.mxu0 %v4218_v4 }
 0x736   : > { %2264 = vmatpush1.bf16.msra.mxu1 %v3615_v29  ;;  %2307 = vmatpush1.bf16.msra.mxu0 %v3617_v15 }
 0x737   : > { %2265 = vmatprep.subr.bf16.mxu1 %v3620_v30  ;;  %2308 = vmatprep.subr.bf16.mxu0 %v3622_v39 }
 0x73a   : > { %2266 = vmatpush1.bf16.msra.mxu1 %v3619_v1  ;;  %2309 = vmatpush1.bf16.msra.mxu0 %v3621_v2 }
 0x73b   : > { %3823 = vmatprep.subr.bf16.mxu1 %v4071_v40  ;;  %3845 = vmatprep.subr.bf16.mxu0 %v4072_v44 }
 0x73d   : > { %3623 = vmatmul.mubr.msk.bf16.vlgmr.msra.gmra.mrb[28].mxu1 %vm623_vm1, %v4540_v43  ;;  %3624 = vmatmul.mubr.msk.bf16.vlgmr.msra.gmra.mrb[32].mxu0 %vm623_vm1, %v4540_v43 }
 0x73e   : > { %3824 = vmatpush3.bf16.msra.mxu1 %v4073_v46  ;;  %3846 = vmatpush3.bf16.msra.mxu0 %v4074_v47 }
 0x73f   : > { %3825 = vmatprep.subr.bf16.mxu1 %v4075_v48  ;;  %3847 = vmatprep.subr.bf16.mxu0 %v4076_v49 }
 0x742   : > { %3826 = vmatpush3.bf16.msra.mxu1 %v4077_v13  ;;  %3848 = vmatpush3.bf16.msra.mxu0 %v4078_v45 }
 0x743   : > { %3827 = vmatprep.subr.bf16.mxu1 %v4079_v51  ;;  %3849 = vmatprep.subr.bf16.mxu0 %v4080_v52 }
 0x746   : > { %3828 = vmatpush3.bf16.msra.mxu1 %v4081_v53  ;;  %3850 = vmatpush3.bf16.msra.mxu0 %v4082_v54 }
 0x747   : > { %3829 = vmatprep.subr.bf16.mxu1 %v4083_v55  ;;  %3851 = vmatprep.subr.bf16.mxu0 %v4084_v56  ;;  %v2179_v56 = vld [vmem:[%s4336_s3 + $0x8] sm:$0xf] }
 0x74a   : > { %3830 = vmatpush3.bf16.msra.mxu1 %v4085_v57  ;;  %3852 = vmatpush3.bf16.msra.mxu0 %v4086_v58  ;;  %v2184_v58 = vrot.slane %v2179_v56, %v4356_v14 }
 0x74b   : > { %3831 = vmatprep.subr.bf16.mxu1 %v4087_v59  ;;  %3853 = vmatprep.subr.bf16.mxu0 %v4088_v60  ;;  %v2192_v59 = vrot.slane %v2179_v56, %v4473_v12  ;;  %v2188_v60 = vrot.slane %v2179_v56, %v4362_v16 }
 0x74e   : > { %3832 = vmatpush3.bf16.msra.mxu1 %v4089_v61  ;;  %3854 = vmatpush3.bf16.msra.mxu0 %v4090_v62  ;;  %v2196_v61 = vrot.slane %v2179_v56, %v4592_v36  ;;  %v4109_v56 = vld [vmem:[%s4306_s29 + $0x308] sm:$0xff]  }
 0x74f   : > { %3833 = vmatprep.subr.bf16.mxu1 %v4091_v63  ;;  %3855 = vmatprep.subr.bf16.mxu0 %v4092_v0 }
 0x752   : > { %3834 = vmatpush3.bf16.msra.mxu1 %v4093_v3  ;;  %3856 = vmatpush3.bf16.msra.mxu0 %v4094_v5 }
 0x753   : > { %3835 = vmatprep.subr.bf16.mxu1 %v4095_v6  ;;  %3857 = vmatprep.subr.bf16.mxu0 %v4096_v7 }
 0x756   : > { %3836 = vmatpush3.bf16.msra.mxu1 %v4097_v8  ;;  %3858 = vmatpush3.bf16.msra.mxu0 %v4098_v9 }
 0x757   : > { %3837 = vmatprep.subr.bf16.mxu1 %v4099_v10  ;;  %3859 = vmatprep.subr.bf16.mxu0 %v4100_v11 }
 0x75a   : > { %3838 = vmatpush3.bf16.msra.mxu1 %v4101_v17  ;;  %3860 = vmatpush3.bf16.msra.mxu0 %v4102_v50 }
 0x75b   : > { %2793 = vmatprep.subr.bf16.mxu1 %v3658_v22  ;;  %2836 = vmatprep.subr.bf16.mxu0 %v3660_v27 }
 0x7e4   : > { %v3751_v31 = vpop.f32.mrb[20].mxu1  ;;  %v3773_v32 = vpop.f32.mrb[24].mxu0 }
 0x7e5   : > { %v3752_v26 = vpop.f32.mrb[21].mxu1  ;;  %v3774_v33 = vpop.f32.mrb[25].mxu0 }
 0x7e6   : > { %v3753_v24 = vadd.f32 %v3752_v26, %v3751_v31  ;;  %v3775_v34 = vadd.f32 %v3774_v33, %v3773_v32  ;;  %v3754_v35 = vpop.f32.mrb[22].mxu1  ;;  %v3776_v25 = vpop.f32.mrb[26].mxu0 }
 0x7e7   : > { %v3755_v37 = vpop.f32.mrb[23].mxu1  ;;  %v3777_v38 = vpop.f32.mrb[27].mxu0 }
 0x7e8   : > { %v1887_v29 = vadd.f32 %v3775_v34, %v3753_v24  ;;  %v3756_v15 = vadd.f32 %v3755_v37, %v3754_v35  ;;  %v3778_v30 = vadd.f32 %v3777_v38, %v3776_v25  ;;  %v2703_v34 = vld [vmem:[%s4321_s12 + $0xb0] sm:$0xff] }
 0x7e9   : > { %v2705_v35 = vld [vmem:[%s4321_s12 + $0xf0] sm:$0xff] }
 0x7ea   : > { %v1890_v39 = vadd.f32 %v3778_v30, %v3756_v15  ;;  %v2704_v15 = vld [vmem:[%s4321_s12 + $0xb8] sm:$0xff] }
 0x7eb   : > { %v2706_v30 = vld [vmem:[%s4321_s12 + $0xf8] sm:$0xff] }
 0x804   : > { %v3795_v1 = vpop.f32.mrb[24].mxu1  ;;  %v3817_v2 = vpop.f32.mrb[28].mxu0 }
 0x805   : > { %v3796_v40 = vpop.f32.mrb[25].mxu1  ;;  %v3818_v44 = vpop.f32.mrb[29].mxu0 }
 0x806   : > { %v3797_v46 = vadd.f32 %v3796_v40, %v3795_v1  ;;  %v3819_v47 = vadd.f32 %v3818_v44, %v3817_v2  ;;  %v3798_v48 = vpop.f32.mrb[26].mxu1  ;;  %v3820_v49 = vpop.f32.mrb[30].mxu0  ;;  %v3662_v44 = vcombine.high %v2703_v34, %v2705_v35 }
 0x807   : > { %v3799_v13 = vpop.f32.mrb[27].mxu1  ;;  %v3821_v45 = vpop.f32.mrb[31].mxu0 }
 0x808   : > { %v2120_v51 = vadd.f32 %v3797_v46, %v1887_v29  ;;  %v3800_v52 = vadd.f32 %v3799_v13, %v3798_v48  ;;  %v3822_v53 = vadd.f32 %v3821_v45, %v3820_v49  ;;  %v3664_v46 = vcombine.high %v2704_v15, %v2706_v30  ;;  %v2709_v48 = vld [vmem:[%s4321_s12 + $0x170] sm:$0xff]  ;;  %v2708_v49 = vld [vmem:[%s4321_s12 + $0x138] sm:$0xff] }
 0x809   : > { %v2710_v13 = vld [vmem:[%s4321_s12 + $0x178] sm:$0xff]  ;;  %v3661_v45 = vcombine.low %v2703_v34, %v2705_v35 }
 0x80a   : > { %v4709_v54 = vadd.f32 %v3819_v47, %v2120_v51  ;;  %v2123_v55 = vadd.f32 %v3800_v52, %v1890_v39  ;;  %v2707_v47 = vld [vmem:[%s4321_s12 + $0x130] sm:$0xff]  ;;  %v3663_v51 = vcombine.low %v2704_v15, %v2706_v30  ;;  %v3667_v19 = vcombine.low %v2708_v49, %v2710_v13 }
 0x80b   : > { %v3666_v52 = vcombine.high %v2707_v47, %v2709_v48  ;;  %v3665_v18 = vcombine.low %v2707_v47, %v2709_v48  ;;  %v2711_v48 = vld [vmem:[%s4336_s3 + $0xc] sm:$0xf] }
 0x80c   : > { %v4712_v57 = vadd.f32 %v3822_v53, %v2123_v55  ;;  %v3668_v53 = vcombine.high %v2708_v49, %v2710_v13  ;;  %v4108_v55 = vld [vmem:[%s4306_s29 + $0x3c8] sm:$0xff]   ;;  %v2716_v13 = vrot.slane %v2711_v48, %v4356_v14 }
 0x810   : > { %v2295_v62 = vpop.f32.mrb[28].mxu1  ;;  %v2338_v63 = vpop.f32.mrb[32].mxu0 }
 0x811   : > { %v2296_v0 = vadd.f32 %v2295_v62, %v2184_v58  ;;  %v2339_v3 = vadd.f32 %v2338_v63, %v2192_v59  ;;  %v2297_v5 = vpop.f32.mrb[29].mxu1  ;;  %v2340_v6 = vpop.f32.mrb[33].mxu0  ;;  %v4114_v62 = vld [vmem:[%s4306_s29 + $0x390] sm:$0xff]   ;;  %v4116_v63 = vld [vmem:[%s4306_s29 + $0x3d8] sm:$0xff]  }
 0x812   : > { %v2298_v7 = vadd.f32 %v2297_v5, %v2188_v60  ;;  %v2341_v8 = vadd.f32 %v2340_v6, %v2196_v61  ;;  %v2299_v9 = vpop.f32.mrb[30].mxu1  ;;  %v2342_v10 = vpop.f32.mrb[34].mxu0  ;;  %v4119_v5 = vld [vmem:[%s4306_s29 + $0x360] sm:$0xff]  }
 0x813   : > { %v2300_v11 = vadd.f32 %v2299_v9, %v2184_v58  ;;  %v2343_v17 = vadd.f32 %v2342_v10, %v2192_v59  ;;  %v2301_v50 = vpop.f32.mrb[31].mxu1  ;;  %v2344_v22 = vpop.f32.mrb[35].mxu0  ;;  %v2347_v32 = vmax.f32 %v2296_v0, 0.0  ;;  %v2349_v26 = vmax.f32 %v2339_v3, 0.0  ;;  %v4110_v58 = vld [vmem:[%s4306_s29 + $0x388] sm:$0xff]   ;;  %v4111_v59 = vld [vmem:[%s4306_s29 + $0x350] sm:$0xff]  }
 0x814   : > { %v2302_v27 = vadd.f32 %v2301_v50, %v2188_v60  ;;  %v2345_v31 = vadd.f32 %v2344_v22, %v2196_v61  ;;  %v2348_v25 = vmax.f32 %v2298_v7, 0.0  ;;  %v2350_v37 = vmax.f32 %v2341_v8, 0.0  ;;  %v4112_v60 = vld [vmem:[%s4306_s29 + $0x3d0] sm:$0xff]   ;;  %v4117_v0 = vld [vmem:[%s4306_s29 + $0x318] sm:$0xff]   ;;  %v4120_v6 = vld [vmem:[%s4306_s29 + $0x3e0] sm:$0xff]  }
 0x815   : > { %v2351_v33 = vmax.f32 %v2300_v11, 0.0  ;;  %v2353_v24 = vmax.f32 %v2343_v17, 0.0  ;;  %v4113_v61 = vld [vmem:[%s4306_s29 + $0x310] sm:$0xff]   ;;  %v4118_v3 = vld [vmem:[%s4306_s29 + $0x398] sm:$0xff]   ;;  %v4121_v7 = vld [vmem:[%s4306_s29 + $0x320] sm:$0xff]  }
 0x816   : > { %v2352_v38 = vmax.f32 %v2302_v27, 0.0  ;;  %v2354_v29 = vmax.f32 %v2345_v31, 0.0  ;;  %v4122_v8 = vld [vmem:[%s4306_s29 + $0x3a0] sm:$0xff]   ;;  %v4123_v9 = vld [vmem:[%s4306_s29 + $0x368] sm:$0xff]   ;;  %v4127_v50 = vld [vmem:[%s4306_s29 + $0x370] sm:$0xff]  }
 0x817   : > { %v2355_v39 = vpack.c.bf16 %v2351_v33, %v2347_v32  ;;  %v2357_v1 = vpack.c.bf16 %v2353_v24, %v2349_v26  ;;  %v4124_v10 = vld [vmem:[%s4306_s29 + $0x3e8] sm:$0xff]   ;;  %v4128_v22 = vld [vmem:[%s4306_s29 + $0x3f0] sm:$0xff]   ;;  %v4131_v32 = vld [vmem:[%s4306_s29 + $0x378] sm:$0xff]  }
 0x818   : > { %v2356_v2 = vpack.c.bf16 %v2352_v38, %v2348_v25  ;;  %v2358_v40 = vpack.c.bf16 %v2354_v29, %v2350_v37  ;;  %v4125_v11 = vld [vmem:[%s4306_s29 + $0x328] sm:$0xff]   ;;  %v4129_v27 = vld [vmem:[%s4306_s29 + $0x330] sm:$0xff]   ;;  %v4132_v26 = vld [vmem:[%s4306_s29 + $0x3f8] sm:$0xff]  }
 0x819   : > { %v4126_v17 = vld [vmem:[%s4306_s29 + $0x3a8] sm:$0xff]   ;;  %v4130_v31 = vld [vmem:[%s4306_s29 + $0x3b0] sm:$0xff]   ;;  %v4133_v33 = vld [vmem:[%s4306_s29 + $0x338] sm:$0xff]  }
 0x81a   : > { %2647 = vmatprep.mubr.bf16.mxu1 %v2356_v2  ;;  %2688 = vmatprep.mubr.bf16.mxu0 %v2358_v40  ;;  %v4134_v24 = vld [vmem:[%s4306_s29 + $0x3b8] sm:$0xff]  }
 0x81b   : > { %2648 = vmatmul.mubr.bf16.vlgmr.msra.gmra.mrb[32].mxu1 %v2355_v39  ;;  %2689 = vmatmul.mubr.bf16.vlgmr.msra.gmra.mrb[36].mxu0 %v2357_v1 }
 0x81c   : > { %2794 = vmatpush1.bf16.msra.mxu1 %v3657_v23  ;;  %2837 = vmatpush1.bf16.msra.mxu0 %v3659_v28  ;;  %v4105_v23 = vld [vmem:[%s4306_s29 + $0x300] sm:$0xff]  }
 0x81d   : > { %2795 = vmatprep.subr.bf16.mxu1 %v3662_v44  ;;  %2838 = vmatprep.subr.bf16.mxu0 %v3664_v46  ;;  %v4106_v28 = vld [vmem:[%s4306_s29 + $0x380] sm:$0xff]  }
 0x81e   : > { %2825 = vmatprep.mubr.bf16.mxu1 %v4218_v4  ;;  %2868 = vmatprep.mubr.bf16.mxu0 %v4218_v4  ;;  %v4107_v4 = vld [vmem:[%s4306_s29 + $0x348] sm:$0xff]  }
 0x820   : > { %2796 = vmatpush1.bf16.msra.mxu1 %v3661_v45  ;;  %2839 = vmatpush1.bf16.msra.mxu0 %v3663_v51  ;;  %v2724_v45 = vrot.slane %v2711_v48, %v4473_v12  ;;  %v2720_v51 = vrot.slane %v2711_v48, %v4362_v16 }
 0x821   : > { %2797 = vmatprep.subr.bf16.mxu1 %v3666_v52  ;;  %2840 = vmatprep.subr.bf16.mxu0 %v3668_v53  ;;  %v2728_v52 = vrot.slane %v2711_v48, %v4592_v36 }
 0x824   : > { %2798 = vmatpush1.bf16.msra.mxu1 %v3665_v18  ;;  %2841 = vmatpush1.bf16.msra.mxu0 %v3667_v19 }
 0x825   : > { %3867 = vmatprep.subr.bf16.mxu1 %v4103_v21  ;;  %3889 = vmatprep.subr.bf16.mxu0 %v4104_v20 }
 0x827   : > { %3669 = vmatmul.mubr.msk.bf16.vlgmr.msra.gmra.mrb[36].mxu1 %vm623_vm1, %v4540_v43  ;;  %3670 = vmatmul.mubr.msk.bf16.vlgmr.msra.gmra.mrb[40].mxu0 %vm623_vm1, %v4540_v43  ;;  %v4115_v43 = vld [vmem:[%s4306_s29 + $0x358] sm:$0xff]  }
 0x828   : > { %3868 = vmatpush3.bf16.msra.mxu1 %v4105_v23  ;;  %3890 = vmatpush3.bf16.msra.mxu0 %v4106_v28 }
 0x829   : > { %3869 = vmatprep.subr.bf16.mxu1 %v4107_v4  ;;  %3891 = vmatprep.subr.bf16.mxu0 %v4108_v55 }
 0x82c   : > { %3870 = vmatpush3.bf16.msra.mxu1 %v4109_v56  ;;  %3892 = vmatpush3.bf16.msra.mxu0 %v4110_v58 }
 0x82d   : > { %3871 = vmatprep.subr.bf16.mxu1 %v4111_v59  ;;  %3893 = vmatprep.subr.bf16.mxu0 %v4112_v60 }
 0x830   : > { %3872 = vmatpush3.bf16.msra.mxu1 %v4113_v61  ;;  %3894 = vmatpush3.bf16.msra.mxu0 %v4114_v62 }
 0x831   : > { %3873 = vmatprep.subr.bf16.mxu1 %v4115_v43  ;;  %3895 = vmatprep.subr.bf16.mxu0 %v4116_v63 }
 0x834   : > { %3874 = vmatpush3.bf16.msra.mxu1 %v4117_v0  ;;  %3896 = vmatpush3.bf16.msra.mxu0 %v4118_v3 }
 0x835   : > { %3875 = vmatprep.subr.bf16.mxu1 %v4119_v5  ;;  %3897 = vmatprep.subr.bf16.mxu0 %v4120_v6 }
 0x838   : > { %3876 = vmatpush3.bf16.msra.mxu1 %v4121_v7  ;;  %3898 = vmatpush3.bf16.msra.mxu0 %v4122_v8 }
 0x839   : > { %3877 = vmatprep.subr.bf16.mxu1 %v4123_v9  ;;  %3899 = vmatprep.subr.bf16.mxu0 %v4124_v10 }
 0x83c   : > { %3878 = vmatpush3.bf16.msra.mxu1 %v4125_v11  ;;  %3900 = vmatpush3.bf16.msra.mxu0 %v4126_v17 }
 0x83d   : > { %3879 = vmatprep.subr.bf16.mxu1 %v4127_v50  ;;  %3901 = vmatprep.subr.bf16.mxu0 %v4128_v22 }
 0x840   : > { %3880 = vmatpush3.bf16.msra.mxu1 %v4129_v27  ;;  %3902 = vmatpush3.bf16.msra.mxu0 %v4130_v31 }
 0x841   : > { %3881 = vmatprep.subr.bf16.mxu1 %v4131_v32  ;;  %3903 = vmatprep.subr.bf16.mxu0 %v4132_v26 }
 0x844   : > { %3882 = vmatpush3.bf16.msra.mxu1 %v4133_v33  ;;  %3904 = vmatpush3.bf16.msra.mxu0 %v4134_v24 }
 0x8ee   : > { %v3839_v34 = vpop.f32.mrb[32].mxu1  ;;  %v3861_v35 = vpop.f32.mrb[36].mxu0 }
 0x8ef   : > { %v3840_v25 = vpop.f32.mrb[33].mxu1  ;;  %v3862_v37 = vpop.f32.mrb[37].mxu0 }
 0x8f0   : > { %v3841_v38 = vadd.f32 %v3840_v25, %v3839_v34  ;;  %v3863_v29 = vadd.f32 %v3862_v37, %v3861_v35  ;;  %v3842_v15 = vpop.f32.mrb[34].mxu1  ;;  %v3864_v30 = vpop.f32.mrb[38].mxu0  ;;  %v3703_v25 = vld [vmem:[%s4331_s13 + $0x1] ss:$0 sm:$0xff] }
 0x8f1   : > { %v3843_v39 = vpop.f32.mrb[35].mxu1  ;;  %v3865_v1 = vpop.f32.mrb[39].mxu0 }
 0x8f2   : > { %v2691_v2 = vadd.f32 %v3863_v29, %v3841_v38  ;;  %v3844_v40 = vadd.f32 %v3843_v39, %v3842_v15  ;;  %v3866_v44 = vadd.f32 %v3865_v1, %v3864_v30 }
 0x8f4   : > { %v2697_v46 = vadd.f32 %v2691_v2, %v4709_v54  ;;  %v2694_v47 = vadd.f32 %v3866_v44, %v3844_v40 }
 0x8f6   : > { %v2698_v49 = vadd.f32 %v2694_v47, %v4712_v57 }
 0x8fa   : > { %v2827_v53 = vpop.f32.mrb[36].mxu1  ;;  %v2870_v18 = vpop.f32.mrb[40].mxu0 }
 0x8fb   : > { %v2828_v19 = vadd.f32 %v2827_v53, %v2716_v13  ;;  %v2871_v21 = vadd.f32 %v2870_v18, %v2724_v45  ;;  %v2829_v20 = vpop.f32.mrb[37].mxu1  ;;  %v2872_v23 = vpop.f32.mrb[41].mxu0 }
 0x8fc   : > { %v2830_v28 = vadd.f32 %v2829_v20, %v2720_v51  ;;  %v2873_v54 = vadd.f32 %v2872_v23, %v2728_v52  ;;  %v2831_v4 = vpop.f32.mrb[38].mxu1  ;;  %v2874_v55 = vpop.f32.mrb[42].mxu0  ;;  %v3704_v20 = vld [vmem:[%s4331_s13 + $0x4] ss:$0 sm:$0xff] }
 0x8fd   : > { %v2832_v56 = vadd.f32 %v2831_v4, %v2716_v13  ;;  %v2875_v57 = vadd.f32 %v2874_v55, %v2724_v45  ;;  %v2833_v58 = vpop.f32.mrb[39].mxu1  ;;  %v2876_v14 = vpop.f32.mrb[43].mxu0  ;;  %v2879_v60 = vmax.f32 %v2828_v19, 0.0  ;;  %v2881_v16 = vmax.f32 %v2871_v21, 0.0 }
 0x8fe   : > { %v2834_v59 = vadd.f32 %v2833_v58, %v2720_v51  ;;  %v2877_v12 = vadd.f32 %v2876_v14, %v2728_v52  ;;  %v2880_v62 = vmax.f32 %v2830_v28, 0.0  ;;  %v2882_v43 = vmax.f32 %v2873_v54, 0.0  ;;  %v3705_v54 = vld [vmem:[%s4331_s13 + $0x5] ss:$0 sm:$0xff] }
 0x8ff   : > { %v2883_v61 = vmax.f32 %v2832_v56, 0.0  ;;  %v2885_v36 = vmax.f32 %v2875_v57, 0.0  ;;  %v4177_v14 = vld [vmem:[%s4838_s10] sm:$0xff] (!%p3706_p5)  }
 0x900   : > { %v2884_v63 = vmax.f32 %v2834_v59, 0.0  ;;  %v2886_v0 = vmax.f32 %v2877_v12, 0.0  ;;  %v4221_v59 = vmov (!%p3706_p5), 0.0   ;;  %v4178_v12 = vld [vmem:[%s4838_s10 + $0x8] sm:$0xff] (!%p3706_p5)  }
 0x901   : > { %v2887_v3 = vpack.c.bf16 %v2883_v61, %v2879_v60  ;;  %v2889_v5 = vpack.c.bf16 %v2885_v36, %v2881_v16  ;;  %3955 = vmatprep.subr.bf16.mxu0 (!%p3706_p5), %v4221_v59  ;;  %v4179_v60 = vld [vmem:[%s4838_s10 + $0x10] sm:$0xff] (!%p3706_p5)   ;;  %v3707_v61 = vld [vmem:[%s4839_s11] ss:$0 sm:$0xff] (!%p3706_p5) }
 0x902   : > { %v2888_v6 = vpack.c.bf16 %v2884_v63, %v2880_v62  ;;  %v2890_v7 = vpack.c.bf16 %v2886_v0, %v2882_v43 }
 0x904   : > { %3179 = vmatprep.mubr.bf16.mxu1 %v2888_v6  ;;  %3220 = vmatprep.mubr.bf16.mxu0 %v2890_v7 }
 0x905   : > { %3180 = vmatmul.mubr.bf16.vlgmr.msra.gmra.mrb[40].mxu1 %v2887_v3  ;;  %3221 = vmatmul.mubr.bf16.vlgmr.msra.gmra.mrb[44].mxu0 %v2889_v5 }
 0x906   : > { %3956 = vmatpush3.bf16.msra.mxu0 (!%p3706_p5), %v4177_v14  ;;  %3961 = vmatprep.mubr.msk.bf16.mxu0 (!%p3706_p5), %vm4222_vm4, %v4221_v59 }
 0x907   : > { %3957 = vmatprep.subr.bf16.mxu0 (!%p3706_p5), %v4221_v59 }
 0x90a   : > { %3958 = vmatpush3.bf16.msra.mxu0 (!%p3706_p5), %v4178_v12 }
 0x90b   : > { %3959 = vmatprep.subr.bf16.mxu0 (!%p3706_p5), %v4221_v59 }
 0x90e   : > { %3960 = vmatpush3.bf16.msra.mxu0 (!%p3706_p5), %v4179_v60 }
 0x9d8   : > { %v3883_v8 = vpop.f32.mrb[40].mxu1  ;;  %v3905_v9 = vpop.f32.mrb[44].mxu0 }
 0x9d9   : > { %v3884_v10 = vpop.f32.mrb[41].mxu1  ;;  %v3906_v11 = vpop.f32.mrb[45].mxu0 }
 0x9da   : > { %v3885_v17 = vadd.f32 %v3884_v10, %v3883_v8  ;;  %v3907_v50 = vadd.f32 %v3906_v11, %v3905_v9  ;;  %v3886_v22 = vpop.f32.mrb[42].mxu1  ;;  %v3908_v27 = vpop.f32.mrb[46].mxu0 }
 0x9db   : > { %v3887_v31 = vpop.f32.mrb[43].mxu1  ;;  %v3909_v32 = vpop.f32.mrb[47].mxu0 }
 0x9dc   : > { %v3223_v26 = vadd.f32 %v3907_v50, %v3885_v17  ;;  %v3888_v33 = vadd.f32 %v3887_v31, %v3886_v22  ;;  %v3910_v24 = vadd.f32 %v3909_v32, %v3908_v27 }
 0x9de   : > { %v3229_v34 = vadd.f32 %v3223_v26, %v2697_v46  ;;  %v3226_v35 = vadd.f32 %v3910_v24, %v3888_v33 }
 0x9e0   : > { %v3230_v37 = vadd.f32 %v3226_v35, %v2698_v49  ;;  %v3231_v38 = vadd.f32 %v3229_v34, %v4534_v41 }
 0x9e2   : > { %v3237_v29 = vadd.f32 %v3703_v25, %v3231_v38  ;;  %v3232_v15 = vadd.f32 %v3230_v37, %v4536_v42 }
 0x9e4   : > { %v3239_v30 = vsel %vm623_vm1, %v3237_v29, 0.0  ;;  %v3238_v39 = vadd.f32 %v3703_v25, %v3232_v15 }
 0x9e5   : > { %3240 = vadd.xlane.f32.xlu0 %v3239_v30 }
 0x9e6   : > { %v3242_v1 = vsel %vm623_vm1, %v3238_v39, 0.0 }
 0x9e7   : > { %3243 = vadd.xlane.f32.xlu1 %v3242_v1 }
 0xa72   : > { %v3241_v2 = vpop.xlane.xlu0 %3240 }
 0xa73   : > { %v3245_v40 = vmul.f32 0.020833334, %v3241_v2 }
 0xa74   : > { %v3244_v44 = vpop.xlane.xlu1 %3243 }
 0xa75   : > { %v3247_v47 = vsub.f32 %v3237_v29, %v3245_v40  ;;  %v3246_v46 = vmul.f32 0.020833334, %v3244_v44 }
 0xa77   : > { %v3248_v48 = vsub.f32 %v3238_v39, %v3246_v46  ;;  %v3249_v49 = vmul.f32 %v3247_v47, %v3247_v47 }
 0xa79   : > { %v3251_v41 = vsel %vm623_vm1, %v3249_v49, 0.0  ;;  %v3250_v13 = vmul.f32 %v3248_v48, %v3248_v48 }
 0xa7a   : > { %3252 = vadd.xlane.f32.xlu0 %v3251_v41 }
 0xa7b   : > { %v3254_v42 = vsel %vm623_vm1, %v3250_v13, 0.0 }
 0xa7c   : > { %3255 = vadd.xlane.f32.xlu1 %v3254_v42 }
 0xb07   : > { %v3253_v45 = vpop.xlane.xlu0 %3252 }
 0xb08   : > { %v3257_v51 = vmul.f32 0.020833334, %v3253_v45 }
 0xb09   : > { %v3256_v52 = vpop.xlane.xlu1 %3255 }
 0xb0a   : > { %v3259_v53 = vadd.f32 1e-05, %v3257_v51  ;;  %v3258_v18 = vmul.f32 0.020833334, %v3256_v52 }
 0xb0c   : > { %4171 = vrsqrt.f32 %v3259_v53  ;;  %v3260_v19 = vadd.f32 1e-05, %v3258_v18 }
 0xb0e   : > { %4173 = vrsqrt.f32 %v3260_v19 }
 0xb16   : > { %v4172_v21 = vpop.eup %4171 }
 0xb17   : > { %v3263_v23 = vmul.f32 %v4172_v21, %v3247_v47 }
 0xb18   : > { %v4174_v28 = vpop.eup %4173 }
 0xb19   : > { %v3269_v4 = vmul.f32 %v3704_v20, %v3263_v23  ;;  %v3264_v55 = vmul.f32 %v4174_v28, %v3248_v48  ;;  %3282 = sbr.rel (%p3706_p5) target bundleno = 3066 (0xbfa), region = 76 }
 0xb1b   : > { %v3275_v56 = vadd.f32 %v3705_v54, %v3269_v4  ;;  %v3270_v57 = vmul.f32 %v3704_v20, %v3264_v55 }
 0xb1d   : > { %3277 = vst.msk [vmem:[#allocation2] sm:$0xff] %vm623_vm1, %v3275_v56  ;;  %v3276_v58 = vadd.f32 %v3705_v54, %v3270_v57 }
 0xb1f   : > { %3278 = vst.msk [vmem:[#allocation2 + $0x8] sm:$0xff] %vm623_vm1, %v3276_v58  ;;  %v3283_v16 = vpack.c.bf16 (!%p3706_p5), %v3276_v58, %v3275_v56 }
 0xb21   : > { %3962 = vmatmul.mubr.msk.bf16.vlgmr.msra.gmra.mrb[0].mxu0 %vm623_vm1, %v3283_v16 }
 0xbf4   : > { %v3352_v36 = vpop.f32.mrb[0].mxu0 }
 0xbf5   : > { %v3353_v62 = vadd.f32 %v3707_v61, %v3352_v36  ;;  %v3963_v43 = vpop.f32.mrb[1].mxu0 }
 0xbf6   : > { %v3355_v63 = vpop.f32.mrb[2].mxu0 }
 0xbf7   : > { %3359 = vst [vmem:[#allocation3] sm:$0xff] %v3353_v62  ;;  %v3356_v0 = vadd.f32 %v3707_v61, %v3355_v63  ;;  %v3964_v3 = vpop.f32.mrb[3].mxu0 }
 0xbf9   : > { %3360 = vst [vmem:[#allocation3 + $0x8] sm:$0xff] %v3356_v0 }
 0xbfa PF: > { %p3974_p6 = scmp.eq.s32.totalorder %s4297_s22, 1  ;;  %s4223_s30 = smov [#allocation3]  }
 0xbfb   : > { %s3367_s16 = sshll.u32 %s4223_s30, 4  ;;  %s3368_s16 = int_to_ptr.vmem [resolvable:$true] %s3367_s16 }
 0xbfc   : > { %s4180_s14 = scalar_lea.vmem %s3368_s16, 256  ;;  %p4187_p10 = scmp.lt.s32.totalorder %s3368_s16, %s3368_s16 }
 0xbfd   : > { %p4181_p7 = scmp.ne.s32.totalorder %s3368_s16, %s4180_s14  ;;  %p4188_p11 = scmp.lt.s32.totalorder %s4180_s14, %s4180_s14 }
 0xbff   : > { %p4182_p8 = pnand %p4181_p7, %p3974_p6  ;;  %p4189_p12 = por %p4188_p11, %p4187_p10 }
 0xc01   : > { %p4183_p9 = pneg %p4182_p8 }
 0xc03   : > { %p4190_p13 = pnand %p4189_p12, %p4183_p9 }
 0xc05   : > { %4193 = shalt.err (!%p4190_p13)
}
 0xc06   : > { %s4849_s21 = sld [smem:[#allocation9_spill]] }
 0xc0c   : > { %s4850_s15 = smov %s4849_s21  ;;  %s4194_s19 = scalar_lea.hbm %s4849_s21, 256 }
 0xc0d   : > { %p4195_p0 = scmp.ne.s32.totalorder %s4850_s15, %s4194_s19  ;;  %p4200_p3 = scmp.lt.u32.totalorder %s4194_s19, %s4850_s15 }
 0xc0f   : > { %p4196_p1 = pnand %p4195_p0, %p3974_p6 }
 0xc11   : > { %p4197_p2 = pneg %p4196_p1 }
 0xc13   : > { %p4202_p4 = pnand %p4200_p3, %p4197_p2 }
 0xc15   : > { %4205 = shalt.err (!%p4202_p4)
}
 0xc16   : > { %s4224_s3 = smov 128   ;;  %s4225_s12 = smov 8  }
 0xc17   : > { %3971 = dma.vmem_to_hbm [thread:$0]  (%p3974_p6), %s3368_s16, 256, %s4850_s15, [#allocation4], %s4224_s3, %s4224_s3, %s4225_s12  }
 0xc18   : > { %4211 = dma.done.wait (%p3974_p6), [#allocation4], 256  }
 0xc19   : > { %4213 = vsyncadd (%p3974_p6), [#allocation4], 4294967040 }
 0xc1a PF: > { %s4851_s13 = sld [smem:[#allocation6_spill]] }
 0xc20   : > { %s23_s21 = sadd.s32 1, %s4851_s13  }
 0xc21   : > { %p20_p5 = scmp.ge.s32.totalorder %s23_s21, 4  }
 0xc23   :  { %22 = sbr.rel (!%p20_p5) target bundleno = 5 (0x5), region = 121 }
 0xc2a   :  { %3383 = vsyncpa [#allocation4], 1 }
 0xc2b   :  { %3385 = vsyncpa [#allocation4 + $0x1], 1 }

</bundles_post_ra>
